<compile_context>
chip_gen: v6e
topology: v6e:2x2x1
jax: 0.10.0
libtpu: 0.0.40
codegen_flags: <defaults>
</compile_context>

<pallas_src>
import functools

import jax
import jax.numpy as jnp
from jax.experimental import pallas as pl
from jax.experimental.pallas import tpu as pltpu

_H1_PAD = 128    # layers[0] = 120 padded to lane width
_H2_PAD = 128    # layers[1] = 60  padded to lane width
_OUT_PAD = 128   # out_sz padded for lane-dense output stores
_BN_EPS = 1e-5
_NEG = -1e30     # mask value for padded logit lanes


def _mlp_kernel(out_valid,
                x_ref, w1_ref, w2_ref, w3_ref, prm_ref,
                o_ref,
                h1_s, h2_s, st1_s, st2_s):
    # prm_ref rows: 0=b1, 1=gamma1, 2=beta1, 3=b2, 4=gamma2, 5=beta2, 6=b3, 7=unused
    p = pl.program_id(0)          # phase
    t = pl.program_id(1)          # batch tile
    tb = x_ref.shape[0]
    inv_n = jnp.float32(1.0 / float(h1_s.shape[0]))   # 1 / total batch (compile-time)
    eps = jnp.float32(_BN_EPS)
    ones_row = jnp.ones((1, tb), jnp.float32)
    off = pl.multiple_of(t * tb, tb)

    @pl.when(jnp.logical_and(p == 0, t == 0))
    def _init_stats():
        st1_s[...] = jnp.zeros_like(st1_s)
        st2_s[...] = jnp.zeros_like(st2_s)

    @pl.when(p == 0)
    def _phase0():  # fc1 + ReLU, stash h1, accumulate BN1 stats on the MXU
        h = jnp.dot(x_ref[...], w1_ref[...], preferred_element_type=jnp.float32)
        h = jnp.maximum(h + prm_ref[0:1, :], 0.0)
        h1_s[pl.ds(off, tb), :] = h
        st1_s[0:1, :] += jnp.dot(ones_row, h, preferred_element_type=jnp.float32)
        st1_s[1:2, :] += jnp.dot(ones_row, h * h, preferred_element_type=jnp.float32)

    @pl.when(p == 1)
    def _phase1():  # BN1 (exact batch stats) + fc2 + ReLU, stash h2, BN2 stats
        mu = st1_s[0:1, :] * inv_n
        var = st1_s[1:2, :] * inv_n - mu * mu
        rsig = jax.lax.rsqrt(var + eps)
        scale = prm_ref[1:2, :] * rsig
        shift = prm_ref[2:3, :] - mu * scale
        h = h1_s[pl.ds(off, tb), :] * scale + shift
        h = jnp.dot(h, w2_ref[...], preferred_element_type=jnp.float32)
        h = jnp.maximum(h + prm_ref[3:4, :], 0.0)
        h2_s[pl.ds(off, tb), :] = h
        st2_s[0:1, :] += jnp.dot(ones_row, h, preferred_element_type=jnp.float32)
        st2_s[1:2, :] += jnp.dot(ones_row, h * h, preferred_element_type=jnp.float32)

    @pl.when(p == 2)
    def _phase2():  # BN2 + fc3 + masked log_softmax, lane-dense store
        mu = st2_s[0:1, :] * inv_n
        var = st2_s[1:2, :] * inv_n - mu * mu
        rsig = jax.lax.rsqrt(var + eps)
        scale = prm_ref[4:5, :] * rsig
        shift = prm_ref[5:6, :] - mu * scale
        h = h2_s[pl.ds(off, tb), :] * scale + shift
        logits = jnp.dot(h, w3_ref[...], preferred_element_type=jnp.float32)
        logits = logits + prm_ref[6:7, :]
        col = jax.lax.broadcasted_iota(jnp.int32, logits.shape, 1)
        logits = jnp.where(col < out_valid, logits, jnp.float32(_NEG))
        m = jnp.max(logits, axis=1, keepdims=True)
        sh = logits - m
        lse = jnp.log(jnp.sum(jnp.exp(sh), axis=1, keepdims=True))
        o_ref[...] = (sh - lse).astype(o_ref.dtype)


def mlp_forward(x, params, *, tb=128):
    """x: (B, in_sz) f32. params: dict from init_params (unpadded logical shapes)."""
    B, in_sz = x.shape
    h1 = params["w1"].shape[1]
    h2 = params["w2"].shape[1]
    out_sz = params["w3"].shape[1]

    tb = min(tb, B)
    assert tb % 8 == 0 and B % tb == 0, (
        "batch must be a multiple of 8 and divide into tiles (exact whole-batch "
        "BatchNorm statistics; no row padding)")
    # TODO(synk): ragged batches would need masked BN statistics.
    num_tiles = B // tb

    # Lane-pad weights; padded rows/cols are exact zeros so padded lanes stay 0.
    w1 = jnp.pad(params["w1"].astype(jnp.float32), ((0, 0), (0, _H1_PAD - h1)))
    w2 = jnp.pad(params["w2"].astype(jnp.float32),
                 ((0, _H1_PAD - h1), (0, _H2_PAD - h2)))
    w3 = jnp.pad(params["w3"].astype(jnp.float32),
                 ((0, _H2_PAD - h2), (0, _OUT_PAD - out_sz)))

    # Pack the seven tiny (1, F) vectors into one (8, 128) slab (single DMA).
    prm = jnp.zeros((8, 128), jnp.float32)
    for row, vec in [(0, params["b1"]), (1, params["g1"]), (2, params["be1"]),
                     (3, params["b2"]), (4, params["g2"]), (5, params["be2"]),
                     (6, params["b3"])]:
        v = vec.reshape(-1).astype(jnp.float32)
        prm = prm.at[row, :v.shape[0]].set(v)

    flops = 2 * B * (in_sz * _H1_PAD + _H1_PAD * _H2_PAD + _H2_PAD * _OUT_PAD
                     + 2 * (_H1_PAD + _H2_PAD))
    bytes_accessed = 4 * (3 * B * in_sz + 3 * B * _OUT_PAD
                          + w1.size + w2.size + w3.size + prm.size)
    cost = pl.CostEstimate(flops=int(flops),
                           transcendentals=int(B * _OUT_PAD + B + 4 * 128),
                           bytes_accessed=int(bytes_accessed))

    grid_spec = pltpu.PrefetchScalarGridSpec(
        num_scalar_prefetch=0,
        grid=(3, num_tiles),                                   # (phase, batch tile)
        in_specs=[
            pl.BlockSpec((tb, in_sz), lambda p, t: (t, 0)),    # x tile, pipelined
            pl.BlockSpec((in_sz, _H1_PAD), lambda p, t: (0, 0)),   # weights resident
            pl.BlockSpec((_H1_PAD, _H2_PAD), lambda p, t: (0, 0)),
            pl.BlockSpec((_H2_PAD, _OUT_PAD), lambda p, t: (0, 0)),
            pl.BlockSpec((8, 128), lambda p, t: (0, 0)),       # packed bias/BN slab
        ],
        out_specs=pl.BlockSpec((tb, _OUT_PAD), lambda p, t: (t, 0)),
        scratch_shapes=[
            pltpu.VMEM((B, _H1_PAD), jnp.float32),   # h1 (post-ReLU), read in phase 1
            pltpu.VMEM((B, _H2_PAD), jnp.float32),   # h2 (post-ReLU), read in phase 2
            pltpu.VMEM((2, _H1_PAD), jnp.float32),   # BN1 [sum; sum of squares]
            pltpu.VMEM((2, _H2_PAD), jnp.float32),   # BN2 [sum; sum of squares]
        ],
    )

    out_padded = pl.pallas_call(
        functools.partial(_mlp_kernel, out_sz),
        out_shape=jax.ShapeDtypeStruct((B, _OUT_PAD), jnp.float32),
        grid_spec=grid_spec,
        compiler_params=pltpu.CompilerParams(
            dimension_semantics=("arbitrary", "arbitrary"),
            vmem_limit_bytes=32 * 1024 * 1024,
        ),
        cost_estimate=cost,
    )(x.astype(jnp.float32), w1, w2, w3, prm)

    return out_padded[:, :out_sz]   # drop padded logit lanes (lane-dense store inside)


def init_params(key, in_sz, out_sz, layers=(120, 60)):
    """Deterministic synthetic parameter init (PyTorch-like uniform fan-in)."""
    ks = jax.random.split(key, 6)

    def linear(kw, kb, fan_in, fan_out):
        bound = 1.0 / jnp.sqrt(jnp.float32(fan_in))
        w = jax.random.uniform(kw, (fan_in, fan_out), jnp.float32, -bound, bound)
        b = jax.random.uniform(kb, (1, fan_out), jnp.float32, -bound, bound)
        return w, b

    w1, b1 = linear(ks[0], ks[1], in_sz, layers[0])
    w2, b2 = linear(ks[2], ks[3], layers[0], layers[1])
    w3, b3 = linear(ks[4], ks[5], layers[1], out_sz)

    return dict(
        w1=w1, b1=b1,
        g1=jnp.ones((1, layers[0]), jnp.float32), be1=jnp.zeros((1, layers[0]), jnp.float32),
        w2=w2, b2=b2,
        g2=jnp.ones((1, layers[1]), jnp.float32), be2=jnp.zeros((1, layers[1]), jnp.float32),
        w3=w3, b3=b3,
    )


def mlp_reference(x, p):
    """Pure-JAX reference of the torch forward (training-mode BN)."""
    eps = 1e-5
    h = jax.nn.relu(x @ p["w1"] + p["b1"])
    mu = h.mean(0, keepdims=True)
    var = ((h - mu) ** 2).mean(0, keepdims=True)
    h = (h - mu) / jnp.sqrt(var + eps) * p["g1"] + p["be1"]
    h = jax.nn.relu(h @ p["w2"] + p["b2"])
    mu = h.mean(0, keepdims=True)
    var = ((h - mu) ** 2).mean(0, keepdims=True)
    h = (h - mu) / jnp.sqrt(var + eps) * p["g2"] + p["be2"]
    logits = h @ p["w3"] + p["b3"]
    return jax.nn.log_softmax(logits, axis=1)


if __name__ == "__main__":
    B, in_sz, out_sz = 256, 64, 10

    key = jax.random.PRNGKey(0)
    kx, kp = jax.random.split(key)
    x = jax.random.normal(kx, (B, in_sz), jnp.float32)
    params = init_params(kp, in_sz, out_sz)

    out = mlp_forward(x, params, tb=128)
    out = jax.block_until_ready(out)

    ref = mlp_reference(x, params)
    assert out.shape == (B, out_sz)
    assert jnp.allclose(out, ref, atol=1e-4, rtol=1e-4), "mismatch vs reference"

    print("KERNEL_OK")
</pallas_src>

<mosaic_0001>
module attributes {stable_mosaic.version = 11 : i64} {
  func.func @_mlp_kernel(%arg0: i32, %arg1: i32, %arg2: memref<128x64xf32, #tpu.memory_space<vmem>>, %arg3: memref<64x128xf32, #tpu.memory_space<vmem>>, %arg4: memref<128x128xf32, #tpu.memory_space<vmem>>, %arg5: memref<128x128xf32, #tpu.memory_space<vmem>>, %arg6: memref<8x128xf32, #tpu.memory_space<vmem>>, %arg7: memref<128x128xf32, #tpu.memory_space<vmem>>, %arg8: memref<256x128xf32, #tpu.memory_space<vmem>>, %arg9: memref<256x128xf32, #tpu.memory_space<vmem>>, %arg10: memref<2x128xf32, #tpu.memory_space<vmem>>, %arg11: memref<2x128xf32, #tpu.memory_space<vmem>>) attributes {dimension_semantics = [#tpu.dimension_semantics<arbitrary>, #tpu.dimension_semantics<arbitrary>], iteration_bounds = array<i64: 3, 2>, scalar_prefetch = 0 : i64, scratch_operands = 4 : i64, tpu.core_type = #tpu.core_type<tc>, window_params = [{transform_indices = @transform_0, window_bounds = array<i64: 128, 64>}, {pipeline_mode = #tpu.pipeline_mode<synchronous>, transform_indices = @transform_1, window_bounds = array<i64: 64, 128>}, {pipeline_mode = #tpu.pipeline_mode<synchronous>, transform_indices = @transform_2, window_bounds = array<i64: 128, 128>}, {pipeline_mode = #tpu.pipeline_mode<synchronous>, transform_indices = @transform_3, window_bounds = array<i64: 128, 128>}, {pipeline_mode = #tpu.pipeline_mode<synchronous>, transform_indices = @transform_4, window_bounds = array<i64: 8, 128>}, {transform_indices = @transform_5, window_bounds = array<i64: 128, 128>}]} {
    %cst = arith.constant 1.000000e+00 : f32
    %0 = vector.broadcast %cst : f32 to vector<1x128xf32>
    %c128_i32 = arith.constant 128 : i32
    %1 = arith.muli %arg1, %c128_i32 : i32
    %2 = tpu.assume_multiple %1, 128 : i32
    %c0_i32 = arith.constant 0 : i32
    %3 = arith.cmpi eq, %arg0, %c0_i32 : i32
    %c0_i32_0 = arith.constant 0 : i32
    %4 = arith.cmpi eq, %arg1, %c0_i32_0 : i32
    %5 = arith.andi %3, %4 : i1
    %6 = arith.extui %5 : i1 to i32
    %c0_i32_1 = arith.constant 0 : i32
    %7 = arith.cmpi ne, %6, %c0_i32_1 : i32
    scf.if %7 {
      %cst_10 = arith.constant 0.000000e+00 : f32
      %17 = vector.broadcast %cst_10 : f32 to vector<2x128xf32>
      %c0 = arith.constant 0 : index
      %c0_11 = arith.constant 0 : index
      %18 = vector.load %arg10[%c0, %c0_11] : memref<2x128xf32, #tpu.memory_space<vmem>>, vector<2x128xf32>
      tpu.vector_store %arg10[%c0, %c0_11], %17 {strides = array<i32>} : memref<2x128xf32, #tpu.memory_space<vmem>>, vector<2x128xf32>,
      %cst_12 = arith.constant 0.000000e+00 : f32
      %19 = vector.broadcast %cst_12 : f32 to vector<2x128xf32>
      %c0_13 = arith.constant 0 : index
      %c0_14 = arith.constant 0 : index
      %20 = vector.load %arg11[%c0_13, %c0_14] : memref<2x128xf32, #tpu.memory_space<vmem>>, vector<2x128xf32>
      tpu.vector_store %arg11[%c0_13, %c0_14], %19 {strides = array<i32>} : memref<2x128xf32, #tpu.memory_space<vmem>>, vector<2x128xf32>,
    } else {
    }
    %c0_i32_2 = arith.constant 0 : i32
    %8 = arith.cmpi eq, %arg0, %c0_i32_2 : i32
    %9 = arith.extui %8 : i1 to i32
    %c0_i32_3 = arith.constant 0 : i32
    %10 = arith.cmpi ne, %9, %c0_i32_3 : i32
    scf.if %10 {
      %c0 = arith.constant 0 : index
      %c0_10 = arith.constant 0 : index
      %17 = vector.load %arg2[%c0, %c0_10] : memref<128x64xf32, #tpu.memory_space<vmem>>, vector<128x64xf32>
      %c0_11 = arith.constant 0 : index
      %c0_12 = arith.constant 0 : index
      %18 = vector.load %arg3[%c0_11, %c0_12] : memref<64x128xf32, #tpu.memory_space<vmem>>, vector<64x128xf32>
      %cst_13 = arith.constant dense<0.000000e+00> : vector<128x128xf32>
      %19 = tpu.matmul %17, %18, %cst_13 {dimension_numbers = #tpu.dot_dimension_numbers<[1], [0], [0], [1], [0, 0, 1, 1], [], []>} : vector<128x64xf32>, vector<64x128xf32>, vector<128x128xf32> -> vector<128x128xf32>
      %c0_14 = arith.constant 0 : index
      %c0_15 = arith.constant 0 : index
      %20 = vector.load %arg6[%c0_14, %c0_15] : memref<8x128xf32, #tpu.memory_space<vmem>>, vector<1x128xf32>
      %21 = vector.broadcast %20 : vector<1x128xf32> to vector<128x128xf32>
      %22 = arith.addf %19, %21 : vector<128x128xf32>
      %cst_16 = arith.constant 0.000000e+00 : f32
      %23 = vector.broadcast %cst_16 : f32 to vector<128x128xf32>
      %24 = arith.maximumf %22, %23 : vector<128x128xf32>
      %25 = arith.index_cast %2 : i32 to index
      %c0_17 = arith.constant 0 : index
      %26 = vector.load %arg8[%25, %c0_17] : memref<256x128xf32, #tpu.memory_space<vmem>>, vector<128x128xf32>
      tpu.vector_store %arg8[%25, %c0_17], %24 {strides = array<i32>} : memref<256x128xf32, #tpu.memory_space<vmem>>, vector<128x128xf32>,
      %c0_18 = arith.constant 0 : index
      %c0_19 = arith.constant 0 : index
      %27 = vector.load %arg10[%c0_18, %c0_19] : memref<2x128xf32, #tpu.memory_space<vmem>>, vector<1x128xf32>
      %cst_20 = arith.constant dense<0.000000e+00> : vector<1x128xf32>
      %28 = tpu.matmul %0, %24, %cst_20 {dimension_numbers = #tpu.dot_dimension_numbers<[1], [0], [0], [1], [0, 0, 1, 1], [], []>} : vector<1x128xf32>, vector<128x128xf32>, vector<1x128xf32> -> vector<1x128xf32>
      %29 = arith.addf %27, %28 : vector<1x128xf32>
      %c0_21 = arith.constant 0 : index
      %c0_22 = arith.constant 0 : index
      %30 = vector.load %arg10[%c0_21, %c0_22] : memref<2x128xf32, #tpu.memory_space<vmem>>, vector<1x128xf32>
      tpu.vector_store %arg10[%c0_21, %c0_22], %29 {strides = array<i32>} : memref<2x128xf32, #tpu.memory_space<vmem>>, vector<1x128xf32>,
      %c1 = arith.constant 1 : index
      %c0_23 = arith.constant 0 : index
      %31 = vector.load %arg10[%c1, %c0_23] : memref<2x128xf32, #tpu.memory_space<vmem>>, vector<1x128xf32>
      %32 = arith.mulf %24, %24 : vector<128x128xf32>
      %cst_24 = arith.constant dense<0.000000e+00> : vector<1x128xf32>
      %33 = tpu.matmul %0, %32, %cst_24 {dimension_numbers = #tpu.dot_dimension_numbers<[1], [0], [0], [1], [0, 0, 1, 1], [], []>} : vector<1x128xf32>, vector<128x128xf32>, vector<1x128xf32> -> vector<1x128xf32>
      %34 = arith.addf %31, %33 : vector<1x128xf32>
      %c1_25 = arith.constant 1 : index
      %c0_26 = arith.constant 0 : index
      %35 = vector.load %arg10[%c1_25, %c0_26] : memref<2x128xf32, #tpu.memory_space<vmem>>, vector<1x128xf32>
      tpu.vector_store %arg10[%c1_25, %c0_26], %34 {strides = array<i32>} : memref<2x128xf32, #tpu.memory_space<vmem>>, vector<1x128xf32>,
    } else {
    }
    %c1_i32 = arith.constant 1 : i32
    %11 = arith.cmpi eq, %arg0, %c1_i32 : i32
    %12 = arith.extui %11 : i1 to i32
    %cst_4 = arith.constant 3.906250e-03 : f32
    %cst_5 = arith.constant 9.99999974E-6 : f32
    %c0_i32_6 = arith.constant 0 : i32
    %13 = arith.cmpi ne, %12, %c0_i32_6 : i32
    scf.if %13 {
      %c0 = arith.constant 0 : index
      %c0_10 = arith.constant 0 : index
      %17 = vector.load %arg10[%c0, %c0_10] : memref<2x128xf32, #tpu.memory_space<vmem>>, vector<1x128xf32>
      %18 = vector.broadcast %cst_4 : f32 to vector<1x128xf32>
      %19 = arith.mulf %17, %18 : vector<1x128xf32>
      %c1 = arith.constant 1 : index
      %c0_11 = arith.constant 0 : index
      %20 = vector.load %arg10[%c1, %c0_11] : memref<2x128xf32, #tpu.memory_space<vmem>>, vector<1x128xf32>
      %21 = vector.broadcast %cst_4 : f32 to vector<1x128xf32>
      %22 = arith.mulf %20, %21 : vector<1x128xf32>
      %23 = arith.mulf %19, %19 : vector<1x128xf32>
      %24 = arith.subf %22, %23 : vector<1x128xf32>
      %25 = vector.broadcast %cst_5 : f32 to vector<1x128xf32>
      %26 = arith.addf %24, %25 : vector<1x128xf32>
      %27 = math.rsqrt %26 : vector<1x128xf32>
      %c1_12 = arith.constant 1 : index
      %c0_13 = arith.constant 0 : index
      %28 = vector.load %arg6[%c1_12, %c0_13] : memref<8x128xf32, #tpu.memory_space<vmem>>, vector<1x128xf32>
      %29 = arith.mulf %28, %27 : vector<1x128xf32>
      %c2 = arith.constant 2 : index
      %c0_14 = arith.constant 0 : index
      %30 = vector.load %arg6[%c2, %c0_14] : memref<8x128xf32, #tpu.memory_space<vmem>>, vector<1x128xf32>
      %31 = arith.mulf %19, %29 : vector<1x128xf32>
      %32 = arith.subf %30, %31 : vector<1x128xf32>
      %33 = arith.index_cast %2 : i32 to index
      %c0_15 = arith.constant 0 : index
      %34 = vector.load %arg8[%33, %c0_15] : memref<256x128xf32, #tpu.memory_space<vmem>>, vector<128x128xf32>
      %35 = vector.broadcast %29 : vector<1x128xf32> to vector<128x128xf32>
      %36 = arith.mulf %34, %35 : vector<128x128xf32>
      %37 = vector.broadcast %32 : vector<1x128xf32> to vector<128x128xf32>
      %38 = arith.addf %36, %37 : vector<128x128xf32>
      %c0_16 = arith.constant 0 : index
      %c0_17 = arith.constant 0 : index
      %39 = vector.load %arg4[%c0_16, %c0_17] : memref<128x128xf32, #tpu.memory_space<vmem>>, vector<128x128xf32>
      %cst_18 = arith.constant dense<0.000000e+00> : vector<128x128xf32>
      %40 = tpu.matmul %38, %39, %cst_18 {dimension_numbers = #tpu.dot_dimension_numbers<[1], [0], [0], [1], [0, 0, 1, 1], [], []>} : vector<128x128xf32>, vector<128x128xf32>, vector<128x128xf32> -> vector<128x128xf32>
      %c3 = arith.constant 3 : index
      %c0_19 = arith.constant 0 : index
      %41 = vector.load %arg6[%c3, %c0_19] : memref<8x128xf32, #tpu.memory_space<vmem>>, vector<1x128xf32>
      %42 = vector.broadcast %41 : vector<1x128xf32> to vector<128x128xf32>
      %43 = arith.addf %40, %42 : vector<128x128xf32>
      %cst_20 = arith.constant 0.000000e+00 : f32
      %44 = vector.broadcast %cst_20 : f32 to vector<128x128xf32>
      %45 = arith.maximumf %43, %44 : vector<128x128xf32>
      %46 = arith.index_cast %2 : i32 to index
      %c0_21 = arith.constant 0 : index
      %47 = vector.load %arg9[%46, %c0_21] : memref<256x128xf32, #tpu.memory_space<vmem>>, vector<128x128xf32>
      tpu.vector_store %arg9[%46, %c0_21], %45 {strides = array<i32>} : memref<256x128xf32, #tpu.memory_space<vmem>>, vector<128x128xf32>,
      %c0_22 = arith.constant 0 : index
      %c0_23 = arith.constant 0 : index
      %48 = vector.load %arg11[%c0_22, %c0_23] : memref<2x128xf32, #tpu.memory_space<vmem>>, vector<1x128xf32>
      %cst_24 = arith.constant dense<0.000000e+00> : vector<1x128xf32>
      %49 = tpu.matmul %0, %45, %cst_24 {dimension_numbers = #tpu.dot_dimension_numbers<[1], [0], [0], [1], [0, 0, 1, 1], [], []>} : vector<1x128xf32>, vector<128x128xf32>, vector<1x128xf32> -> vector<1x128xf32>
      %50 = arith.addf %48, %49 : vector<1x128xf32>
      %c0_25 = arith.constant 0 : index
      %c0_26 = arith.constant 0 : index
      %51 = vector.load %arg11[%c0_25, %c0_26] : memref<2x128xf32, #tpu.memory_space<vmem>>, vector<1x128xf32>
      tpu.vector_store %arg11[%c0_25, %c0_26], %50 {strides = array<i32>} : memref<2x128xf32, #tpu.memory_space<vmem>>, vector<1x128xf32>,
      %c1_27 = arith.constant 1 : index
      %c0_28 = arith.constant 0 : index
      %52 = vector.load %arg11[%c1_27, %c0_28] : memref<2x128xf32, #tpu.memory_space<vmem>>, vector<1x128xf32>
      %53 = arith.mulf %45, %45 : vector<128x128xf32>
      %cst_29 = arith.constant dense<0.000000e+00> : vector<1x128xf32>
      %54 = tpu.matmul %0, %53, %cst_29 {dimension_numbers = #tpu.dot_dimension_numbers<[1], [0], [0], [1], [0, 0, 1, 1], [], []>} : vector<1x128xf32>, vector<128x128xf32>, vector<1x128xf32> -> vector<1x128xf32>
      %55 = arith.addf %52, %54 : vector<1x128xf32>
      %c1_30 = arith.constant 1 : index
      %c0_31 = arith.constant 0 : index
      %56 = vector.load %arg11[%c1_30, %c0_31] : memref<2x128xf32, #tpu.memory_space<vmem>>, vector<1x128xf32>
      tpu.vector_store %arg11[%c1_30, %c0_31], %55 {strides = array<i32>} : memref<2x128xf32, #tpu.memory_space<vmem>>, vector<1x128xf32>,
    } else {
    }
    %c2_i32 = arith.constant 2 : i32
    %14 = arith.cmpi eq, %arg0, %c2_i32 : i32
    %15 = arith.extui %14 : i1 to i32
    %cst_7 = arith.constant 3.906250e-03 : f32
    %cst_8 = arith.constant 9.99999974E-6 : f32
    %c0_i32_9 = arith.constant 0 : i32
    %16 = arith.cmpi ne, %15, %c0_i32_9 : i32
    scf.if %16 {
      %c0 = arith.constant 0 : index
      %c0_10 = arith.constant 0 : index
      %17 = vector.load %arg11[%c0, %c0_10] : memref<2x128xf32, #tpu.memory_space<vmem>>, vector<1x128xf32>
      %18 = vector.broadcast %cst_7 : f32 to vector<1x128xf32>
      %19 = arith.mulf %17, %18 : vector<1x128xf32>
      %c1 = arith.constant 1 : index
      %c0_11 = arith.constant 0 : index
      %20 = vector.load %arg11[%c1, %c0_11] : memref<2x128xf32, #tpu.memory_space<vmem>>, vector<1x128xf32>
      %21 = vector.broadcast %cst_7 : f32 to vector<1x128xf32>
      %22 = arith.mulf %20, %21 : vector<1x128xf32>
      %23 = arith.mulf %19, %19 : vector<1x128xf32>
      %24 = arith.subf %22, %23 : vector<1x128xf32>
      %25 = vector.broadcast %cst_8 : f32 to vector<1x128xf32>
      %26 = arith.addf %24, %25 : vector<1x128xf32>
      %27 = math.rsqrt %26 : vector<1x128xf32>
      %c4 = arith.constant 4 : index
      %c0_12 = arith.constant 0 : index
      %28 = vector.load %arg6[%c4, %c0_12] : memref<8x128xf32, #tpu.memory_space<vmem>>, vector<1x128xf32>
      %29 = arith.mulf %28, %27 : vector<1x128xf32>
      %c5 = arith.constant 5 : index
      %c0_13 = arith.constant 0 : index
      %30 = vector.load %arg6[%c5, %c0_13] : memref<8x128xf32, #tpu.memory_space<vmem>>, vector<1x128xf32>
      %31 = arith.mulf %19, %29 : vector<1x128xf32>
      %32 = arith.subf %30, %31 : vector<1x128xf32>
      %33 = arith.index_cast %2 : i32 to index
      %c0_14 = arith.constant 0 : index
      %34 = vector.load %arg9[%33, %c0_14] : memref<256x128xf32, #tpu.memory_space<vmem>>, vector<128x128xf32>
      %35 = vector.broadcast %29 : vector<1x128xf32> to vector<128x128xf32>
      %36 = arith.mulf %34, %35 : vector<128x128xf32>
      %37 = vector.broadcast %32 : vector<1x128xf32> to vector<128x128xf32>
      %38 = arith.addf %36, %37 : vector<128x128xf32>
      %c0_15 = arith.constant 0 : index
      %c0_16 = arith.constant 0 : index
      %39 = vector.load %arg5[%c0_15, %c0_16] : memref<128x128xf32, #tpu.memory_space<vmem>>, vector<128x128xf32>
      %cst_17 = arith.constant dense<0.000000e+00> : vector<128x128xf32>
      %40 = tpu.matmul %38, %39, %cst_17 {dimension_numbers = #tpu.dot_dimension_numbers<[1], [0], [0], [1], [0, 0, 1, 1], [], []>} : vector<128x128xf32>, vector<128x128xf32>, vector<128x128xf32> -> vector<128x128xf32>
      %c6 = arith.constant 6 : index
      %c0_18 = arith.constant 0 : index
      %41 = vector.load %arg6[%c6, %c0_18] : memref<8x128xf32, #tpu.memory_space<vmem>>, vector<1x128xf32>
      %42 = vector.broadcast %41 : vector<1x128xf32> to vector<128x128xf32>
      %43 = arith.addf %40, %42 : vector<128x128xf32>
      %44 = tpu.iota {dimensions = array<i32: 1>} : vector<128x128xi32>
      %c10_i32 = arith.constant 10 : i32
      %45 = vector.broadcast %c10_i32 : i32 to vector<128x128xi32>
      %46 = arith.cmpi slt, %44, %45 : vector<128x128xi32>
      %cst_19 = arith.constant -1.000000e+30 : f32
      %47 = vector.broadcast %cst_19 : f32 to vector<128x128xf32>
      %48 = arith.select %46, %43, %47 : vector<128x128xi1>, vector<128x128xf32>
      %cst_20 = arith.constant dense<0xFF800000> : vector<128xf32>
      %49 = vector.multi_reduction <maximumf>, %48, %cst_20 [1] : vector<128x128xf32> to vector<128xf32>
      %50 = vector.shape_cast %49 : vector<128xf32> to vector<128x1xf32>
      %51 = vector.broadcast %50 : vector<128x1xf32> to vector<128x128xf32>
      %52 = arith.subf %48, %51 : vector<128x128xf32>
      %53 = math.exp %52 : vector<128x128xf32>
      %cst_21 = arith.constant dense<0.000000e+00> : vector<128xf32>
      %54 = vector.multi_reduction <add>, %53, %cst_21 [1] : vector<128x128xf32> to vector<128xf32>
      %55 = vector.shape_cast %54 : vector<128xf32> to vector<128x1xf32>
      %56 = math.log %55 : vector<128x1xf32>
      %57 = vector.broadcast %56 : vector<128x1xf32> to vector<128x128xf32>
      %58 = arith.subf %52, %57 : vector<128x128xf32>
      %c0_22 = arith.constant 0 : index
      %c0_23 = arith.constant 0 : index
      %59 = vector.load %arg7[%c0_22, %c0_23] : memref<128x128xf32, #tpu.memory_space<vmem>>, vector<128x128xf32>
      tpu.vector_store %arg7[%c0_22, %c0_23], %58 {strides = array<i32>} : memref<128x128xf32, #tpu.memory_space<vmem>>, vector<128x128xf32>,
    } else {
    }
    return
  }
  func.func @transform_0(%arg0: i32, %arg1: i32) -> (i32, i32) {
    %c0_i32 = arith.constant 0 : i32
    %c0_i32_0 = arith.constant 0 : i32
    return %arg1, %c0_i32 : i32, i32
  }
  func.func @transform_1(%arg0: i32, %arg1: i32) -> (i32, i32) {
    %c0_i32 = arith.constant 0 : i32
    %c0_i32_0 = arith.constant 0 : i32
    %c0_i32_1 = arith.constant 0 : i32
    return %c0_i32, %c0_i32_0 : i32, i32
  }
  func.func @transform_2(%arg0: i32, %arg1: i32) -> (i32, i32) {
    %c0_i32 = arith.constant 0 : i32
    %c0_i32_0 = arith.constant 0 : i32
    %c0_i32_1 = arith.constant 0 : i32
    return %c0_i32, %c0_i32_0 : i32, i32
  }
  func.func @transform_3(%arg0: i32, %arg1: i32) -> (i32, i32) {
    %c0_i32 = arith.constant 0 : i32
    %c0_i32_0 = arith.constant 0 : i32
    %c0_i32_1 = arith.constant 0 : i32
    return %c0_i32, %c0_i32_0 : i32, i32
  }
  func.func @transform_4(%arg0: i32, %arg1: i32) -> (i32, i32) {
    %c0_i32 = arith.constant 0 : i32
    %c0_i32_0 = arith.constant 0 : i32
    %c0_i32_1 = arith.constant 0 : i32
    return %c0_i32, %c0_i32_0 : i32, i32
  }
  func.func @transform_5(%arg0: i32, %arg1: i32) -> (i32, i32) {
    %c0_i32 = arith.constant 0 : i32
    %c0_i32_0 = arith.constant 0 : i32
    return %arg1, %c0_i32 : i32, i32
  }
}

</mosaic_0001>

<bundles_post_ra>
// kernel: tpu_custom_call.1
= control target key start
LH: loop header
LB: loop body
LE: loop exit
PB: predicated region body
PF: predicated region fallthrough
CT: control target
= control target key end

     0   :  { %10 = vsyncpa [#allocation7], 0  ;;  %s3129_s0 = inlined_call_operand.vmem [shape: f32[256,64], index: 0, kind: input, shape index: {}]   ;;  %s3130_s1 = inlined_call_operand.vmem [shape: f32[64,128], index: 1, kind: input, shape index: {}]   ;;  %s3131_s2 = inlined_call_operand.vmem [shape: f32[128,128], index: 2, kind: input, shape index: {}]   ;;  %s3132_s3 = inlined_call_operand.vmem [shape: f32[128,128], index: 3, kind: input, shape index: {}]   ;;  %s3133_s4 = inlined_call_operand.vmem [shape: f32[8,128], index: 4, kind: input, shape index: {}]   ;;  %s3134_s5 = inlined_call_operand.hbm [shape: f32[256,128], index: 5, kind: output, shape index: {}]  }
   0x1   :  { %12 = vsyncpa [#allocation7 + $0x1], 0  ;;  %s2432_s18 = smov 0   ;;  %s2434_s19 = smov 0  }
   0x2   :  { %s2436_s20 = smov 0   ;;  %s2438_s21 = smov 0  }
   0x3   :  { %s2440_s22 = smov 0   ;;  %s2442_s23 = smov 0  }
   0x4   :  { %s2444_s24 = smov 0   ;;  %s2446_s25 = smov 0  }
   0x5 LB: > { %s1633_s26 = sadd.s32 4294967295, %s2390_s25   ;;  %s1634_s27 = sadd.s32 4294967294, %s2390_s25   ;;  %s2390_s25 = sphi %s2446_s25, %s18_s25   ;;  %s2386_s24 = sphi %s2444_s24, %s3143_s24   ;;  %s2382_s23 = sphi %s2442_s23, %s3142_s23   ;;  %s2378_s22 = sphi %s2440_s22, %s3141_s22   ;;  %s2374_s21 = sphi %s2438_s21, %s3140_s21   ;;  %s2370_s20 = sphi %s2436_s20, %s3139_s20   ;;  %s2366_s19 = sphi %s2434_s19, %s3138_s19   ;;  %s2362_s18 = sphi %s2432_s18, %s3137_s18  }
   0x6   : > { %s27_s28 = sadd.s32 1, %s2382_s23  ;;  %s30_s29 = sadd.s32 1, %s2386_s24 }
   0x7   : > { %p28_p0 = scmp.ge.s32.totalorder %s27_s28, 2  ;;  %s147_s30 = sadd.s32 1, %s2370_s20 }
   0x8   : > { %p157_p1 = scmp.ne.s32.totalorder %s2370_s20, %s2366_s19  ;;  %p158_p2 = scmp.eq.s32.totalorder %s1633_s26, 5 }
   0x9   : > { %s3145_s28 = smov (%p28_p0, %s27_s28), 0  ;;  %s3147_s29 = smov (!%p28_p0, %s30_s29), %s2386_s24 }
   0xa   : > { %s144_s6 = ssub.s32 %s2382_s23, %s3145_s28  ;;  %p2484_p3 = por %p158_p2, %p157_p1 }
   0xb   : > { %p32_p4 = scmp.ge.s32.totalorder %s3147_s29, 3  ;;  %p145_p5 = scmp.eq.s32.totalorder %s144_s6, 0 }
   0xc   : > { %p163_p6 = scmp.ne.s32.totalorder %s2366_s19, %s2362_s18  ;;  %p164_p7 = scmp.eq.s32.totalorder %s1634_s27, 5 }
   0xd   : > { %s3149_s29 = smov (%p32_p4, %s3147_s29), 0  ;;  %p1637_p9 = scmp.ge.s32.totalorder %s2390_s25, 1 }
   0xe   : > { %s2493_s8 = scalar_select %p145_p5, %s2370_s20, %s147_s30  }
   0xf   : > { %p2495_p8 = por %p164_p7, %p163_p6  ;;  %p203_p10 = scmp.lt.s32.totalorder %s2390_s25, 7 }
  0x11   : > { %p204_p11 = pnand %p1637_p9, %p203_p10 }
  0x12   : > { %s228_s10 = sand.u32 (!%p204_p11), 1, %s2366_s19   ;;  %s1639_s11 = sshll.u32 (!%p204_p11), %s2374_s21, 4 }
  0x13   : > { %207 = sbr.rel (%p204_p11) target bundleno = 1616 (0x650), region = 40  ;;  %s1638_s12 = sshll.u32 (!%p204_p11), %s228_s10, 7 }
  0x14   : > { %p232_p12 = scmp.lt.s32.totalorder (!%p204_p11), %s1639_s11, 31  ;;  %s2506_s13 = sshll.u32 (!%p204_p11), %s2374_s21, 7 }
  0x15   : > { %p239_p13 = scmp.eq.s32.totalorder (!%p204_p11), %s2378_s22, 0  ;;  %p240_p0 = scmp.eq.s32.totalorder (!%p204_p11), %s2374_s21, 0 }
  0x16   : > { %s2515_s26 = scalar_lea.vmem (!%p204_p11), [#allocation6], %s1638_s12 }
  0x17   : > { %p241_p1 = pnand (!%p204_p11), %p240_p0, %p239_p13 }
  0x18   : > { %s3151_s11 = smov (!%p232_p12, %s1639_s11), 31 }
  0x19   : > { %s1640_s14 = sshll.u32 %s3151_s11, 3  ;;  %244 = sbr.rel (%p241_p1) target bundleno = 32 (0x20), region = 44 }
  0x1a   : > { %s2513_s17 = scalar_lea.vmem %s3129_s0, %s1640_s14 }
  0x1e   : > { %v2392_v0 = vmov 0.0  }
  0x1f   : > { %245 = vst [vmem:[#allocation4] sm:$0x3] %v2392_v0  ;;  %246 = vst [vmem:[#allocation5] sm:$0x3] %v2392_v0 }
  0x20 PF: > { %p1642_p2 = scmp.ne.s32.totalorder %s2378_s22, 0 }
  0x22   : > { %249 = sbr.rel (%p1642_p2) target bundleno = 510 (0x1fe), region = 48 }
  0x27   : > { %v273_v1 = vld [vmem:[%s3130_s1 + $0x38] sm:$0xff]  ;;  %v272_v2 = vld [vmem:[%s3130_s1 + $0x30] sm:$0xff]  ;;  %vm279_vm0 = vcmask 523264   ;;  %v271_v3 = vld [vmem:[%s3130_s1 + $0x28] sm:$0xff]  ;;  %v2393_v25 = vmov 0.0   ;;  %vm2394_vm1 = vmmov 0  }
  0x28   : > { %1826 = vmatprep.subr.mxu0 %v273_v1  ;;  %v250_v4 = vld [vmem:[%s2513_s17] sm:$0xff]  ;;  %v269_v6 = vld [vmem:[%s3130_s1 + $0x18] sm:$0xff]  ;;  %v268_v7 = vld [vmem:[%s3130_s1 + $0x10] sm:$0xff]  ;;  %1866 = vmatprep.subr.mxu1 %v2393_v25 }
  0x29   : > { %1827 = vmatpush3.msra.mxu0 %v273_v1  ;;  %1842 = vmatprep.mubr.msk.f32.mxu0 %vm279_vm0, %v250_v4  ;;  %v270_v5 = vld [vmem:[%s3130_s1 + $0x20] sm:$0xff]  ;;  %v267_v8 = vld [vmem:[%s3130_s1 + $0x8] sm:$0xff]  ;;  %v252_v11 = vld [vmem:[%s2513_s17 + $0x10] sm:$0xff] }
  0x2a   : > { %1828 = vmatprep.subr.mxu0 %v272_v2  ;;  %v266_v9 = vld [vmem:[%s3130_s1] sm:$0xff]  ;;  %v251_v10 = vld [vmem:[%s2513_s17 + $0x8] sm:$0xff]  ;;  %v253_v12 = vld [vmem:[%s2513_s17 + $0x18] sm:$0xff]  ;;  %1898 = vmatprep.mubr.msk.f32.mxu1 %vm2394_vm1, %v2393_v25 }
  0x2b   : > { %1829 = vmatpush3.msra.mxu0 %v272_v2  ;;  %v254_v13 = vld [vmem:[%s2513_s17 + $0x20] sm:$0xff]  ;;  %v255_v14 = vld [vmem:[%s2513_s17 + $0x28] sm:$0xff]  ;;  %v256_v15 = vld [vmem:[%s2513_s17 + $0x30] sm:$0xff] }
  0x2c   : > { %1830 = vmatprep.subr.mxu0 %v271_v3  ;;  %v257_v16 = vld [vmem:[%s2513_s17 + $0x38] sm:$0xff]  ;;  %v258_v17 = vld [vmem:[%s2513_s17 + $0x40] sm:$0xff]  ;;  %v259_v18 = vld [vmem:[%s2513_s17 + $0x48] sm:$0xff] }
  0x2d   : > { %1831 = vmatpush3.msra.mxu0 %v271_v3  ;;  %v260_v19 = vld [vmem:[%s2513_s17 + $0x50] sm:$0xff]  ;;  %v261_v20 = vld [vmem:[%s2513_s17 + $0x58] sm:$0xff]  ;;  %v262_v21 = vld [vmem:[%s2513_s17 + $0x60] sm:$0xff] }
  0x2e   : > { %1832 = vmatprep.subr.mxu0 %v270_v5  ;;  %v263_v22 = vld [vmem:[%s2513_s17 + $0x68] sm:$0xff]  ;;  %v264_v23 = vld [vmem:[%s2513_s17 + $0x70] sm:$0xff]  ;;  %v265_v24 = vld [vmem:[%s2513_s17 + $0x78] sm:$0xff]  ;;  %s2584_s17 = scalar_lea.vmem [#allocation2], %s2506_s13 }
  0x2f   : > { %1833 = vmatpush3.msra.mxu0 %v270_v5  ;;  %v1643_v26 = vld [vmem:[%s3133_s4] ss:$0 sm:$0xff] }
  0x30   : > { %1834 = vmatprep.subr.mxu0 %v269_v6 }
  0x31   : > { %1835 = vmatpush3.msra.mxu0 %v269_v6 }
  0x32   : > { %1836 = vmatprep.subr.mxu0 %v268_v7 }
  0x33   : > { %1837 = vmatpush3.msra.mxu0 %v268_v7 }
  0x34   : > { %1838 = vmatprep.subr.mxu0 %v267_v8 }
  0x35   : > { %1839 = vmatpush3.msra.mxu0 %v267_v8 }
  0x36   : > { %1840 = vmatprep.subr.mxu0 %v266_v9 }
  0x37   : > { %1841 = vmatpush3.msra.mxu0 %v266_v9 }
  0x38   : > { %1843 = vmatmul.mubr.msk.f32.vlgmr.msra.gmra.mxu0 %vm279_vm0, %v251_v10  ;;  %1901 = vmatprep.subr.mxu0 %v2393_v25 }
  0x39   : > { %1845 = vmatprep.mubr.msk.f32.mxu0 %vm279_vm0, %v252_v11 }
  0x3c   : > { %1846 = vmatmul.mubr.msk.f32.gmra.mxu0 %vm279_vm0, %v253_v12 }
  0x3d   : > { %1848 = vmatprep.mubr.msk.f32.mxu0 %vm279_vm0, %v254_v13 }
  0x40   : > { %1849 = vmatmul.mubr.msk.f32.gmra.mxu0 %vm279_vm0, %v255_v14 }
  0x41   : > { %1851 = vmatprep.mubr.msk.f32.mxu0 %vm279_vm0, %v256_v15 }
  0x44   : > { %1852 = vmatmul.mubr.msk.f32.gmra.mxu0 %vm279_vm0, %v257_v16 }
  0x45   : > { %1854 = vmatprep.mubr.msk.f32.mxu0 %vm279_vm0, %v258_v17 }
  0x48   : > { %1855 = vmatmul.mubr.msk.f32.gmra.mxu0 %vm279_vm0, %v259_v18 }
  0x49   : > { %1857 = vmatprep.mubr.msk.f32.mxu0 %vm279_vm0, %v260_v19 }
  0x4c   : > { %1858 = vmatmul.mubr.msk.f32.gmra.mxu0 %vm279_vm0, %v261_v20 }
  0x4d   : > { %1860 = vmatprep.mubr.msk.f32.mxu0 %vm279_vm0, %v262_v21 }
  0x50   : > { %1861 = vmatmul.mubr.msk.f32.gmra.mxu0 %vm279_vm0, %v263_v22 }
  0x51   : > { %1863 = vmatprep.mubr.msk.f32.mxu0 %vm279_vm0, %v264_v23 }
  0x54   : > { %1864 = vmatmul.mubr.msk.f32.gmra.mxu0 %vm279_vm0, %v265_v24 }
  0x55   : > { %1933 = vmatprep.mubr.msk.f32.mxu0 %vm2394_vm1, %v2393_v25 }
  0xf8   : > { %v1844_v27 = vpop.f32.mrf.mxu0 }
  0xf9   : > { %v400_v28 = vadd.f32 %v1844_v27, %v1643_v26 }
  0xfa   : > { %v394_v29 = vpop.f32.mrf.mxu0 }
  0xfb   : > { %v2581_v30 = vmax.f32 %v400_v28, 0.0  ;;  %v395_v31 = vadd.f32 %v1643_v26, %v394_v29  ;;  %v2395_v28 = vmov 1.0   ;;  %v506_v29 = vld [vmem:[#allocation4] sm:$0x1] }
  0xfc   : > { %v1847_v32 = vpop.f32.mrf.mxu0 }
  0xfd   : > { %491 = vst [vmem:[%s2584_s17 + $0x8] sm:$0xff] %v2581_v30  ;;  %v2588_v33 = vmax.f32 %v395_v31, 0.0  ;;  %v410_v34 = vadd.f32 %v1847_v32, %v1643_v26 }
  0xfe   : > { %v404_v35 = vpop.f32.mrf.mxu0 }
  0xff   : > { %490 = vst [vmem:[%s2584_s17] sm:$0xff] %v2588_v33  ;;  %v2592_v36 = vmax.f32 %v410_v34, 0.0  ;;  %v405_v37 = vadd.f32 %v1643_v26, %v404_v35  ;;  %v580_v27 = vmul.f32 %v2588_v33, %v2588_v33 }
 0x100   : > { %v1850_v38 = vpop.f32.mrf.mxu0 }
 0x101   : > { %493 = vst [vmem:[%s2584_s17 + $0x18] sm:$0xff] %v2592_v36  ;;  %v2596_v39 = vmax.f32 %v405_v37, 0.0  ;;  %v420_v40 = vadd.f32 %v1850_v38, %v1643_v26  ;;  %v583_v23 = vmul.f32 %v2592_v36, %v2592_v36 }
 0x102   : > { %v414_v41 = vpop.f32.mrf.mxu0 }
 0x103   : > { %492 = vst [vmem:[%s2584_s17 + $0x10] sm:$0xff] %v2596_v39  ;;  %v2600_v42 = vmax.f32 %v420_v40, 0.0  ;;  %v415_v43 = vadd.f32 %v1643_v26, %v414_v41  ;;  %v582_v24 = vmul.f32 %v2596_v39, %v2596_v39 }
 0x104   : > { %v1853_v44 = vpop.f32.mrf.mxu0 }
 0x105   : > { %495 = vst [vmem:[%s2584_s17 + $0x28] sm:$0xff] %v2600_v42  ;;  %v2604_v45 = vmax.f32 %v415_v43, 0.0  ;;  %v430_v46 = vadd.f32 %v1853_v44, %v1643_v26  ;;  %v585_v21 = vmul.f32 %v2600_v42, %v2600_v42 }
 0x106   : > { %v424_v47 = vpop.f32.mrf.mxu0 }
 0x107   : > { %494 = vst [vmem:[%s2584_s17 + $0x20] sm:$0xff] %v2604_v45  ;;  %v2608_v48 = vmax.f32 %v430_v46, 0.0  ;;  %v425_v49 = vadd.f32 %v1643_v26, %v424_v47  ;;  %v584_v22 = vmul.f32 %v2604_v45, %v2604_v45 }
 0x108   : > { %v1856_v50 = vpop.f32.mrf.mxu0 }
 0x109   : > { %497 = vst [vmem:[%s2584_s17 + $0x38] sm:$0xff] %v2608_v48  ;;  %v2612_v51 = vmax.f32 %v425_v49, 0.0  ;;  %v440_v52 = vadd.f32 %v1856_v50, %v1643_v26  ;;  %v587_v19 = vmul.f32 %v2608_v48, %v2608_v48 }
 0x10a   : > { %v434_v53 = vpop.f32.mrf.mxu0 }
 0x10b   : > { %496 = vst [vmem:[%s2584_s17 + $0x30] sm:$0xff] %v2612_v51  ;;  %v482_v54 = vmax.f32 %v440_v52, 0.0  ;;  %v435_v55 = vadd.f32 %v1643_v26, %v434_v53  ;;  %v586_v20 = vmul.f32 %v2612_v51, %v2612_v51 }
 0x10c   : > { %v1859_v56 = vpop.f32.mrf.mxu0 }
 0x10d   : > { %499 = vst [vmem:[%s2584_s17 + $0x48] sm:$0xff] %v482_v54  ;;  %v481_v57 = vmax.f32 %v435_v55, 0.0  ;;  %v450_v58 = vadd.f32 %v1859_v56, %v1643_v26  ;;  %v589_v17 = vmul.f32 %v482_v54, %v482_v54 }
 0x10e   : > { %v444_v59 = vpop.f32.mrf.mxu0 }
 0x10f   : > { %498 = vst [vmem:[%s2584_s17 + $0x40] sm:$0xff] %v481_v57  ;;  %v484_v60 = vmax.f32 %v450_v58, 0.0  ;;  %v445_v61 = vadd.f32 %v1643_v26, %v444_v59  ;;  %v588_v18 = vmul.f32 %v481_v57, %v481_v57 }
 0x110   : > { %v1862_v62 = vpop.f32.mrf.mxu0 }
 0x111   : > { %501 = vst [vmem:[%s2584_s17 + $0x58] sm:$0xff] %v484_v60  ;;  %v483_v63 = vmax.f32 %v445_v61, 0.0  ;;  %v460_v0 = vadd.f32 %v1862_v62, %v1643_v26  ;;  %v591_v15 = vmul.f32 %v484_v60, %v484_v60 }
 0x112   : > { %v454_v1 = vpop.f32.mrf.mxu0 }
 0x113   : > { %500 = vst [vmem:[%s2584_s17 + $0x50] sm:$0xff] %v483_v63  ;;  %v486_v2 = vmax.f32 %v460_v0, 0.0  ;;  %v455_v3 = vadd.f32 %v1643_v26, %v454_v1  ;;  %v590_v16 = vmul.f32 %v483_v63, %v483_v63 }
 0x114   : > { %v1865_v4 = vpop.f32.mrf.mxu0 }
 0x115   : > { %503 = vst [vmem:[%s2584_s17 + $0x68] sm:$0xff] %v486_v2  ;;  %v485_v5 = vmax.f32 %v455_v3, 0.0  ;;  %v470_v6 = vadd.f32 %v1865_v4, %v1643_v26  ;;  %v593_v13 = vmul.f32 %v486_v2, %v486_v2 }
 0x116   : > { %v464_v7 = vpop.f32.mrf.mxu0 }
 0x117   : > { %502 = vst [vmem:[%s2584_s17 + $0x60] sm:$0xff] %v485_v5  ;;  %v488_v8 = vmax.f32 %v470_v6, 0.0  ;;  %v465_v9 = vadd.f32 %v1643_v26, %v464_v7  ;;  %v592_v14 = vmul.f32 %v485_v5, %v485_v5  ;;  %v581_v26 = vmul.f32 %v2581_v30, %v2581_v30 }
 0x119   : > { %505 = vst [vmem:[%s2584_s17 + $0x78] sm:$0xff] %v488_v8  ;;  %v595_v10 = vmul.f32 %v488_v8, %v488_v8  ;;  %v487_v11 = vmax.f32 %v465_v9, 0.0  ;;  %1867 = vmatpush3.msra.mxu1 %v488_v8 }
 0x11a   : > { %1868 = vmatprep.subr.mxu1 %v2393_v25 }
 0x11b   : > { %504 = vst [vmem:[%s2584_s17 + $0x70] sm:$0xff] %v487_v11  ;;  %v594_v12 = vmul.f32 %v487_v11, %v487_v11  ;;  %1869 = vmatpush3.msra.mxu1 %v487_v11  ;;  %1902 = vmatpush3.msra.mxu0 %v595_v10 }
 0x11c   : > { %1870 = vmatprep.subr.mxu1 %v2393_v25  ;;  %1903 = vmatprep.subr.mxu0 %v2393_v25 }
 0x11d   : > { %1871 = vmatpush3.msra.mxu1 %v486_v2  ;;  %1904 = vmatpush3.msra.mxu0 %v594_v12 }
 0x11e   : > { %1872 = vmatprep.subr.mxu1 %v2393_v25  ;;  %1905 = vmatprep.subr.mxu0 %v2393_v25 }
 0x11f   : > { %1873 = vmatpush3.msra.mxu1 %v485_v5  ;;  %1906 = vmatpush3.msra.mxu0 %v593_v13 }
 0x120   : > { %1874 = vmatprep.subr.mxu1 %v2393_v25  ;;  %1907 = vmatprep.subr.mxu0 %v2393_v25 }
 0x121   : > { %1875 = vmatpush3.msra.mxu1 %v484_v60  ;;  %1908 = vmatpush3.msra.mxu0 %v592_v14 }
 0x122   : > { %1876 = vmatprep.subr.mxu1 %v2393_v25  ;;  %1909 = vmatprep.subr.mxu0 %v2393_v25 }
 0x123   : > { %1877 = vmatpush3.msra.mxu1 %v483_v63  ;;  %1910 = vmatpush3.msra.mxu0 %v591_v15 }
 0x124   : > { %1878 = vmatprep.subr.mxu1 %v2393_v25  ;;  %1911 = vmatprep.subr.mxu0 %v2393_v25 }
 0x125   : > { %1879 = vmatpush3.msra.mxu1 %v482_v54  ;;  %1912 = vmatpush3.msra.mxu0 %v590_v16 }
 0x126   : > { %1880 = vmatprep.subr.mxu1 %v2393_v25  ;;  %1913 = vmatprep.subr.mxu0 %v2393_v25 }
 0x127   : > { %1881 = vmatpush3.msra.mxu1 %v481_v57  ;;  %1914 = vmatpush3.msra.mxu0 %v589_v17 }
 0x128   : > { %1882 = vmatprep.subr.mxu1 %v2393_v25  ;;  %1915 = vmatprep.subr.mxu0 %v2393_v25 }
 0x129   : > { %1883 = vmatpush3.msra.mxu1 %v2608_v48  ;;  %1916 = vmatpush3.msra.mxu0 %v588_v18 }
 0x12a   : > { %1884 = vmatprep.subr.mxu1 %v2393_v25  ;;  %1917 = vmatprep.subr.mxu0 %v2393_v25 }
 0x12b   : > { %1885 = vmatpush3.msra.mxu1 %v2612_v51  ;;  %1918 = vmatpush3.msra.mxu0 %v587_v19 }
 0x12c   : > { %1886 = vmatprep.subr.mxu1 %v2393_v25  ;;  %1919 = vmatprep.subr.mxu0 %v2393_v25 }
 0x12d   : > { %1887 = vmatpush3.msra.mxu1 %v2600_v42  ;;  %1920 = vmatpush3.msra.mxu0 %v586_v20 }
 0x12e   : > { %1888 = vmatprep.subr.mxu1 %v2393_v25  ;;  %1921 = vmatprep.subr.mxu0 %v2393_v25 }
 0x12f   : > { %1889 = vmatpush3.msra.mxu1 %v2604_v45  ;;  %1922 = vmatpush3.msra.mxu0 %v585_v21 }
 0x130   : > { %1890 = vmatprep.subr.mxu1 %v2393_v25  ;;  %1923 = vmatprep.subr.mxu0 %v2393_v25 }
 0x131   : > { %1891 = vmatpush3.msra.mxu1 %v2592_v36  ;;  %1924 = vmatpush3.msra.mxu0 %v584_v22 }
 0x132   : > { %1892 = vmatprep.subr.mxu1 %v2393_v25  ;;  %1925 = vmatprep.subr.mxu0 %v2393_v25 }
 0x133   : > { %1893 = vmatpush3.msra.mxu1 %v2596_v39  ;;  %1926 = vmatpush3.msra.mxu0 %v583_v23 }
 0x134   : > { %1894 = vmatprep.subr.mxu1 %v2393_v25  ;;  %1927 = vmatprep.subr.mxu0 %v2393_v25 }
 0x135   : > { %1895 = vmatpush3.msra.mxu1 %v2581_v30  ;;  %1928 = vmatpush3.msra.mxu0 %v582_v24  ;;  %v579_v30 = vld [vmem:[#allocation4 + $0x1] sm:$0x1] }
 0x136   : > { %1896 = vmatprep.subr.mxu1 %v2393_v25  ;;  %1929 = vmatprep.subr.mxu0 %v2393_v25 }
 0x137   : > { %1897 = vmatpush3.msra.mxu1 %v2588_v33  ;;  %1930 = vmatpush3.msra.mxu0 %v581_v26 }
 0x138   : > { %1931 = vmatprep.subr.mxu0 %v2393_v25  ;;  %1899 = vmatmul.mubr.f32.vlgmr.msra.gmra.mxu1 %v2395_v28 }
 0x139   : > { %1932 = vmatpush3.msra.mxu0 %v580_v27 }
 0x13a   : > { %1934 = vmatmul.mubr.f32.vlgmr.msra.gmra.mxu0 %v2395_v28 }
 0x1f8   : > { %v573_v31 = vpop.f32.mrf.mxu1 }
 0x1f9   : > { %v577_v32 = vadd.f32 %v573_v31, %v506_v29 }
 0x1fa   : > { %v662_v34 = vpop.f32.mrf.mxu0  ;;  %v1900_v35 = vpop.f32.mrf.mxu1 }
 0x1fb   : > { %578 = vst [vmem:[#allocation4] sm:$0x1] %v577_v32  ;;  %v666_v36 = vadd.f32 %v662_v34, %v579_v30 }
 0x1fc   : > { %v1935_v37 = vpop.f32.mrf.mxu0 }
 0x1fd   : > { %667 = vst [vmem:[#allocation4 + $0x1] sm:$0x1] %v666_v36 }
 0x1fe PF: > { %p1660_p4 = scmp.ne.s32.totalorder %s2378_s22, 1 }
 0x1ff   : > { %s2734_s6 = scalar_lea.vmem (!%p1660_p4), [#allocation2], %s2506_s13  ;;  %s2762_s14 = scalar_lea.vmem (!%p1660_p4), [#allocation3], %s2506_s13 }
 0x200   : > { %671 = sbr.rel (%p1660_p4) target bundleno = 1007 (0x3ef), region = 52 }
 0x205   : > { %v757_v25 = vld [vmem:[%s3131_s2 + $0x78] sm:$0xff]  ;;  %v756_v33 = vld [vmem:[%s3131_s2 + $0x70] sm:$0xff]  ;;  %v755_v38 = vld [vmem:[%s3131_s2 + $0x68] sm:$0xff]  ;;  %v702_v54 = vlaneseq  ;;  %vm2397_vm2 = vmmov 0  }
 0x206   : > { %1936 = vmatprep.subr.mxu0 %v757_v25  ;;  %v754_v39 = vld [vmem:[%s3131_s2 + $0x60] sm:$0xff]  ;;  %v753_v42 = vld [vmem:[%s3131_s2 + $0x58] sm:$0xff]  ;;  %v752_v45 = vld [vmem:[%s3131_s2 + $0x50] sm:$0xff] }
 0x207   : > { %1937 = vmatpush3.msra.mxu0 %v757_v25  ;;  %v672_v40 = vld [vmem:[#allocation4] sm:$0x1]  ;;  %v674_v41 = vld [vmem:[#allocation4 + $0x1] sm:$0x1]  ;;  %v751_v47 = vld [vmem:[%s3131_s2 + $0x48] sm:$0xff]  ;;  %v703_v57 = vshrl.u32 %v702_v54, 7 }
 0x208   : > { %1938 = vmatprep.subr.mxu0 %v756_v33  ;;  %v673_v43 = vmul.f32 0.00390625, %v672_v40  ;;  %v675_v44 = vmul.f32 0.00390625, %v674_v41  ;;  %v750_v49 = vld [vmem:[%s3131_s2 + $0x40] sm:$0xff]  ;;  %v749_v51 = vld [vmem:[%s3131_s2 + $0x38] sm:$0xff]  ;;  %v748_v52 = vld [vmem:[%s3131_s2 + $0x30] sm:$0xff]  ;;  %v2396_v54 = vmov 0.0  }
 0x209   : > { %1939 = vmatpush3.msra.mxu0 %v756_v33  ;;  %v747_v53 = vld [vmem:[%s3131_s2 + $0x28] sm:$0xff]  ;;  %v746_v55 = vld [vmem:[%s3131_s2 + $0x20] sm:$0xff]  ;;  %v745_v56 = vld [vmem:[%s3131_s2 + $0x18] sm:$0xff]  ;;  %v704_v61 = vsub.s32 0, %v703_v57  ;;  %1992 = vmatprep.subr.mxu1 %v2396_v54 }
 0x20a   : > { %1940 = vmatprep.subr.mxu0 %v755_v38  ;;  %v676_v46 = vmul.f32 %v673_v43, %v673_v43  ;;  %v744_v58 = vld [vmem:[%s3131_s2 + $0x10] sm:$0xff]  ;;  %v680_v59 = vld [vmem:[%s3133_s4 + $0x1] sm:$0x1]  ;;  %v743_v60 = vld [vmem:[%s3131_s2 + $0x8] sm:$0xff]  ;;  %2024 = vmatprep.mubr.msk.f32.mxu1 %vm2397_vm2, %v2396_v54 }
 0x20b   : > { %1941 = vmatpush3.msra.mxu0 %v755_v38  ;;  %v742_v63 = vld [vmem:[%s3131_s2] sm:$0xff]  ;;  %v687_v3 = vld [vmem:[%s2734_s6 + $0x8] sm:$0xff]  ;;  %v688_v4 = vld [vmem:[%s2734_s6 + $0x10] sm:$0xff] }
 0x20c   : > { %1942 = vmatprep.subr.mxu0 %v754_v39  ;;  %v677_v48 = vsub.f32 %v675_v44, %v676_v46  ;;  %v682_v1 = vld [vmem:[%s3133_s4 + $0x2] sm:$0x1]  ;;  %v689_v11 = vld [vmem:[%s2734_s6 + $0x18] sm:$0xff]  ;;  %v691_v19 = vld [vmem:[%s2734_s6 + $0x28] sm:$0xff] }
 0x20d   : > { %1943 = vmatpush3.msra.mxu0 %v754_v39  ;;  %v686_v2 = vld [vmem:[%s2734_s6] sm:$0xff]  ;;  %v692_v20 = vld [vmem:[%s2734_s6 + $0x30] sm:$0xff]  ;;  %v693_v26 = vld [vmem:[%s2734_s6 + $0x38] sm:$0xff] }
 0x20e   : > { %1944 = vmatprep.subr.mxu0 %v753_v42  ;;  %v678_v50 = vadd.f32 1e-05, %v677_v48  ;;  %v690_v12 = vld [vmem:[%s2734_s6 + $0x20] sm:$0xff]  ;;  %v695_v32 = vld [vmem:[%s2734_s6 + $0x48] sm:$0xff]  ;;  %v696_v34 = vld [vmem:[%s2734_s6 + $0x50] sm:$0xff] }
 0x20f   : > { %1945 = vmatpush3.msra.mxu0 %v753_v42  ;;  %v694_v27 = vld [vmem:[%s2734_s6 + $0x40] sm:$0xff]  ;;  %v697_v33 = vld [vmem:[%s2734_s6 + $0x58] sm:$0xff]  ;;  %v700_v44 = vld [vmem:[%s2734_s6 + $0x70] sm:$0xff] }
 0x210   : > { %1946 = vmatprep.subr.mxu0 %v752_v45  ;;  %2230 = vrsqrt.f32 %v678_v50  ;;  %v698_v38 = vld [vmem:[%s2734_s6 + $0x60] sm:$0xff] }
 0x211   : > { %1947 = vmatpush3.msra.mxu0 %v752_v45 }
 0x212   : > { %1948 = vmatprep.subr.mxu0 %v751_v47 }
 0x213   : > { %1949 = vmatpush3.msra.mxu0 %v751_v47 }
 0x214   : > { %1950 = vmatprep.subr.mxu0 %v750_v49 }
 0x215   : > { %1951 = vmatpush3.msra.mxu0 %v750_v49  ;;  %v701_v49 = vld [vmem:[%s2734_s6 + $0x78] sm:$0xff] }
 0x216   : > { %1952 = vmatprep.subr.mxu0 %v749_v51 }
 0x217   : > { %1953 = vmatpush3.msra.mxu0 %v749_v51 }
 0x218   : > { %1954 = vmatprep.subr.mxu0 %v748_v52 }
 0x219   : > { %1955 = vmatpush3.msra.mxu0 %v748_v52 }
 0x21a   : > { %1956 = vmatprep.subr.mxu0 %v747_v53 }
 0x21b   : > { %1957 = vmatpush3.msra.mxu0 %v747_v53 }
 0x21c   : > { %1958 = vmatprep.subr.mxu0 %v746_v55 }
 0x21d   : > { %1959 = vmatpush3.msra.mxu0 %v746_v55  ;;  %v2231_v62 = vpop.eup %2230  ;;  %v1661_v55 = vld [vmem:[%s3133_s4 + $0x3] ss:$0 sm:$0xff] }
 0x21e   : > { %1960 = vmatprep.subr.mxu0 %v745_v56  ;;  %v681_v0 = vmul.f32 %v2231_v62, %v680_v59 }
 0x21f   : > { %1961 = vmatpush3.msra.mxu0 %v745_v56 }
 0x220   : > { %1962 = vmatprep.subr.mxu0 %v744_v58  ;;  %v683_v5 = vmul.f32 %v681_v0, %v673_v43  ;;  %v705_v6 = vrot.slane %v681_v0, %v704_v61  ;;  %v699_v43 = vld [vmem:[%s2734_s6 + $0x68] sm:$0xff] }
 0x221   : > { %1963 = vmatpush3.msra.mxu0 %v744_v58 }
 0x222   : > { %1964 = vmatprep.subr.mxu0 %v743_v60  ;;  %v684_v7 = vsub.f32 %v682_v1, %v683_v5  ;;  %v706_v8 = vmul.f32 %v705_v6, %v686_v2  ;;  %v707_v9 = vmul.f32 %v705_v6, %v687_v3  ;;  %v708_v10 = vmul.f32 %v705_v6, %v688_v4 }
 0x223   : > { %1965 = vmatpush3.msra.mxu0 %v743_v60  ;;  %v709_v14 = vmul.f32 %v705_v6, %v689_v11  ;;  %v710_v18 = vmul.f32 %v705_v6, %v690_v12  ;;  %v711_v22 = vmul.f32 %v705_v6, %v691_v19  ;;  %v712_v24 = vmul.f32 %v705_v6, %v692_v20 }
 0x224   : > { %1966 = vmatprep.subr.mxu0 %v742_v63  ;;  %v725_v13 = vrot.slane %v684_v7, %v704_v61  ;;  %v713_v29 = vmul.f32 %v705_v6, %v693_v26  ;;  %v714_v30 = vmul.f32 %v705_v6, %v694_v27  ;;  %v715_v36 = vmul.f32 %v705_v6, %v695_v32 }
 0x225   : > { %1967 = vmatpush3.msra.mxu0 %v742_v63  ;;  %v716_v25 = vmul.f32 %v705_v6, %v696_v34  ;;  %v717_v40 = vmul.f32 %v705_v6, %v697_v33  ;;  %v718_v42 = vmul.f32 %v705_v6, %v698_v38  ;;  %v719_v46 = vmul.f32 %v705_v6, %v699_v43 }
 0x226   : > { %v726_v15 = vadd.f32 %v725_v13, %v706_v8  ;;  %v727_v16 = vadd.f32 %v725_v13, %v707_v9  ;;  %v728_v17 = vadd.f32 %v725_v13, %v708_v10  ;;  %v729_v21 = vadd.f32 %v725_v13, %v709_v14  ;;  %2027 = vmatprep.subr.mxu0 %v2396_v54 }
 0x227   : > { %v730_v23 = vadd.f32 %v725_v13, %v710_v18  ;;  %v731_v28 = vadd.f32 %v725_v13, %v711_v22  ;;  %v732_v31 = vadd.f32 %v725_v13, %v712_v24  ;;  %v733_v35 = vadd.f32 %v725_v13, %v713_v29 }
 0x228   : > { %1968 = vmatprep.mubr.f32.mxu0 %v726_v15  ;;  %v734_v37 = vadd.f32 %v725_v13, %v714_v30  ;;  %v735_v39 = vadd.f32 %v725_v13, %v715_v36  ;;  %v736_v41 = vadd.f32 %v725_v13, %v716_v25  ;;  %v737_v45 = vadd.f32 %v725_v13, %v717_v40 }
 0x229   : > { %1969 = vmatmul.mubr.f32.vlgmr.msra.gmra.mxu0 %v727_v16  ;;  %v738_v47 = vadd.f32 %v725_v13, %v718_v42  ;;  %v720_v48 = vmul.f32 %v705_v6, %v700_v44  ;;  %v739_v50 = vadd.f32 %v725_v13, %v719_v46  ;;  %v721_v51 = vmul.f32 %v705_v6, %v701_v49 }
 0x22a   : > { %1971 = vmatprep.mubr.f32.mxu0 %v728_v17 }
 0x22b   : > { %v740_v52 = vadd.f32 %v725_v13, %v720_v48  ;;  %v741_v53 = vadd.f32 %v725_v13, %v721_v51 }
 0x22d   : > { %1972 = vmatmul.mubr.f32.gmra.mxu0 %v729_v21 }
 0x22e   : > { %1974 = vmatprep.mubr.f32.mxu0 %v730_v23 }
 0x231   : > { %1975 = vmatmul.mubr.f32.gmra.mxu0 %v731_v28 }
 0x232   : > { %1977 = vmatprep.mubr.f32.mxu0 %v732_v31 }
 0x235   : > { %1978 = vmatmul.mubr.f32.gmra.mxu0 %v733_v35 }
 0x236   : > { %1980 = vmatprep.mubr.f32.mxu0 %v734_v37 }
 0x239   : > { %1981 = vmatmul.mubr.f32.gmra.mxu0 %v735_v39 }
 0x23a   : > { %1983 = vmatprep.mubr.f32.mxu0 %v736_v41 }
 0x23d   : > { %1984 = vmatmul.mubr.f32.gmra.mxu0 %v737_v45 }
 0x23e   : > { %1986 = vmatprep.mubr.f32.mxu0 %v738_v47 }
 0x241   : > { %1987 = vmatmul.mubr.f32.gmra.mxu0 %v739_v50 }
 0x242   : > { %1989 = vmatprep.mubr.f32.mxu0 %v740_v52 }
 0x245   : > { %1990 = vmatmul.mubr.f32.gmra.mxu0 %v741_v53 }
 0x246   : > { %2059 = vmatprep.mubr.msk.f32.mxu0 %vm2397_vm2, %v2396_v54 }
 0x2e9   : > { %v1970_v56 = vpop.f32.mrf.mxu0 }
 0x2ea   : > { %v835_v57 = vadd.f32 %v1970_v56, %v1661_v55 }
 0x2eb   : > { %v829_v58 = vpop.f32.mrf.mxu0 }
 0x2ec   : > { %v2759_v59 = vmax.f32 %v835_v57, 0.0  ;;  %v830_v60 = vadd.f32 %v1661_v55, %v829_v58  ;;  %v2398_v57 = vmov 1.0   ;;  %v941_v58 = vld [vmem:[#allocation5] sm:$0x1] }
 0x2ed   : > { %v1973_v61 = vpop.f32.mrf.mxu0 }
 0x2ee   : > { %926 = vst [vmem:[%s2762_s14 + $0x8] sm:$0xff] %v2759_v59  ;;  %v2766_v62 = vmax.f32 %v830_v60, 0.0  ;;  %v845_v63 = vadd.f32 %v1973_v61, %v1661_v55 }
 0x2ef   : > { %v839_v0 = vpop.f32.mrf.mxu0 }
 0x2f0   : > { %925 = vst [vmem:[%s2762_s14] sm:$0xff] %v2766_v62  ;;  %v2770_v1 = vmax.f32 %v845_v63, 0.0  ;;  %v840_v2 = vadd.f32 %v1661_v55, %v839_v0  ;;  %v1015_v56 = vmul.f32 %v2766_v62, %v2766_v62 }
 0x2f1   : > { %v1976_v3 = vpop.f32.mrf.mxu0 }
 0x2f2   : > { %928 = vst [vmem:[%s2762_s14 + $0x18] sm:$0xff] %v2770_v1  ;;  %v2774_v4 = vmax.f32 %v840_v2, 0.0  ;;  %v855_v5 = vadd.f32 %v1976_v3, %v1661_v55  ;;  %v1018_v52 = vmul.f32 %v2770_v1, %v2770_v1 }
 0x2f3   : > { %v849_v6 = vpop.f32.mrf.mxu0 }
 0x2f4   : > { %927 = vst [vmem:[%s2762_s14 + $0x10] sm:$0xff] %v2774_v4  ;;  %v2778_v7 = vmax.f32 %v855_v5, 0.0  ;;  %v850_v8 = vadd.f32 %v1661_v55, %v849_v6  ;;  %v1017_v53 = vmul.f32 %v2774_v4, %v2774_v4 }
 0x2f5   : > { %v1979_v9 = vpop.f32.mrf.mxu0 }
 0x2f6   : > { %930 = vst [vmem:[%s2762_s14 + $0x28] sm:$0xff] %v2778_v7  ;;  %v2782_v10 = vmax.f32 %v850_v8, 0.0  ;;  %v865_v11 = vadd.f32 %v1979_v9, %v1661_v55  ;;  %v1020_v50 = vmul.f32 %v2778_v7, %v2778_v7 }
 0x2f7   : > { %v859_v12 = vpop.f32.mrf.mxu0 }
 0x2f8   : > { %929 = vst [vmem:[%s2762_s14 + $0x20] sm:$0xff] %v2782_v10  ;;  %v2786_v13 = vmax.f32 %v865_v11, 0.0  ;;  %v860_v14 = vadd.f32 %v1661_v55, %v859_v12  ;;  %v1019_v51 = vmul.f32 %v2782_v10, %v2782_v10 }
 0x2f9   : > { %v1982_v15 = vpop.f32.mrf.mxu0 }
 0x2fa   : > { %932 = vst [vmem:[%s2762_s14 + $0x38] sm:$0xff] %v2786_v13  ;;  %v2790_v16 = vmax.f32 %v860_v14, 0.0  ;;  %v875_v17 = vadd.f32 %v1982_v15, %v1661_v55  ;;  %v1022_v48 = vmul.f32 %v2786_v13, %v2786_v13 }
 0x2fb   : > { %v869_v18 = vpop.f32.mrf.mxu0 }
 0x2fc   : > { %931 = vst [vmem:[%s2762_s14 + $0x30] sm:$0xff] %v2790_v16  ;;  %v917_v19 = vmax.f32 %v875_v17, 0.0  ;;  %v870_v20 = vadd.f32 %v1661_v55, %v869_v18  ;;  %v1021_v49 = vmul.f32 %v2790_v16, %v2790_v16 }
 0x2fd   : > { %v1985_v21 = vpop.f32.mrf.mxu0 }
 0x2fe   : > { %934 = vst [vmem:[%s2762_s14 + $0x48] sm:$0xff] %v917_v19  ;;  %v916_v22 = vmax.f32 %v870_v20, 0.0  ;;  %v885_v23 = vadd.f32 %v1985_v21, %v1661_v55  ;;  %v1024_v46 = vmul.f32 %v917_v19, %v917_v19 }
 0x2ff   : > { %v879_v24 = vpop.f32.mrf.mxu0 }
 0x300   : > { %933 = vst [vmem:[%s2762_s14 + $0x40] sm:$0xff] %v916_v22  ;;  %v919_v26 = vmax.f32 %v885_v23, 0.0  ;;  %v880_v27 = vadd.f32 %v1661_v55, %v879_v24  ;;  %v1023_v47 = vmul.f32 %v916_v22, %v916_v22 }
 0x301   : > { %v1988_v28 = vpop.f32.mrf.mxu0 }
 0x302   : > { %936 = vst [vmem:[%s2762_s14 + $0x58] sm:$0xff] %v919_v26  ;;  %v918_v29 = vmax.f32 %v880_v27, 0.0  ;;  %v895_v31 = vadd.f32 %v1988_v28, %v1661_v55  ;;  %v1026_v44 = vmul.f32 %v919_v26, %v919_v26 }
 0x303   : > { %v889_v30 = vpop.f32.mrf.mxu0 }
 0x304   : > { %935 = vst [vmem:[%s2762_s14 + $0x50] sm:$0xff] %v918_v29  ;;  %v921_v32 = vmax.f32 %v895_v31, 0.0  ;;  %v890_v34 = vadd.f32 %v1661_v55, %v889_v30  ;;  %v1025_v45 = vmul.f32 %v918_v29, %v918_v29 }
 0x305   : > { %v1991_v35 = vpop.f32.mrf.mxu0 }
 0x306   : > { %938 = vst [vmem:[%s2762_s14 + $0x68] sm:$0xff] %v921_v32  ;;  %v920_v36 = vmax.f32 %v890_v34, 0.0  ;;  %v905_v37 = vadd.f32 %v1991_v35, %v1661_v55  ;;  %v1028_v42 = vmul.f32 %v921_v32, %v921_v32 }
 0x307   : > { %v899_v25 = vpop.f32.mrf.mxu0 }
 0x308   : > { %937 = vst [vmem:[%s2762_s14 + $0x60] sm:$0xff] %v920_v36  ;;  %v923_v33 = vmax.f32 %v905_v37, 0.0  ;;  %v900_v38 = vadd.f32 %v1661_v55, %v899_v25  ;;  %v1027_v43 = vmul.f32 %v920_v36, %v920_v36  ;;  %v1016_v55 = vmul.f32 %v2759_v59, %v2759_v59 }
 0x30a   : > { %940 = vst [vmem:[%s2762_s14 + $0x78] sm:$0xff] %v923_v33  ;;  %v1030_v39 = vmul.f32 %v923_v33, %v923_v33  ;;  %v922_v40 = vmax.f32 %v900_v38, 0.0  ;;  %1993 = vmatpush3.msra.mxu1 %v923_v33 }
 0x30b   : > { %1994 = vmatprep.subr.mxu1 %v2396_v54 }
 0x30c   : > { %939 = vst [vmem:[%s2762_s14 + $0x70] sm:$0xff] %v922_v40  ;;  %v1029_v41 = vmul.f32 %v922_v40, %v922_v40  ;;  %1995 = vmatpush3.msra.mxu1 %v922_v40  ;;  %2028 = vmatpush3.msra.mxu0 %v1030_v39 }
 0x30d   : > { %1996 = vmatprep.subr.mxu1 %v2396_v54  ;;  %2029 = vmatprep.subr.mxu0 %v2396_v54 }
 0x30e   : > { %1997 = vmatpush3.msra.mxu1 %v921_v32  ;;  %2030 = vmatpush3.msra.mxu0 %v1029_v41 }
 0x30f   : > { %1998 = vmatprep.subr.mxu1 %v2396_v54  ;;  %2031 = vmatprep.subr.mxu0 %v2396_v54 }
 0x310   : > { %1999 = vmatpush3.msra.mxu1 %v920_v36  ;;  %2032 = vmatpush3.msra.mxu0 %v1028_v42 }
 0x311   : > { %2000 = vmatprep.subr.mxu1 %v2396_v54  ;;  %2033 = vmatprep.subr.mxu0 %v2396_v54 }
 0x312   : > { %2001 = vmatpush3.msra.mxu1 %v919_v26  ;;  %2034 = vmatpush3.msra.mxu0 %v1027_v43 }
 0x313   : > { %2002 = vmatprep.subr.mxu1 %v2396_v54  ;;  %2035 = vmatprep.subr.mxu0 %v2396_v54 }
 0x314   : > { %2003 = vmatpush3.msra.mxu1 %v918_v29  ;;  %2036 = vmatpush3.msra.mxu0 %v1026_v44 }
 0x315   : > { %2004 = vmatprep.subr.mxu1 %v2396_v54  ;;  %2037 = vmatprep.subr.mxu0 %v2396_v54 }
 0x316   : > { %2005 = vmatpush3.msra.mxu1 %v917_v19  ;;  %2038 = vmatpush3.msra.mxu0 %v1025_v45 }
 0x317   : > { %2006 = vmatprep.subr.mxu1 %v2396_v54  ;;  %2039 = vmatprep.subr.mxu0 %v2396_v54 }
 0x318   : > { %2007 = vmatpush3.msra.mxu1 %v916_v22  ;;  %2040 = vmatpush3.msra.mxu0 %v1024_v46 }
 0x319   : > { %2008 = vmatprep.subr.mxu1 %v2396_v54  ;;  %2041 = vmatprep.subr.mxu0 %v2396_v54 }
 0x31a   : > { %2009 = vmatpush3.msra.mxu1 %v2786_v13  ;;  %2042 = vmatpush3.msra.mxu0 %v1023_v47 }
 0x31b   : > { %2010 = vmatprep.subr.mxu1 %v2396_v54  ;;  %2043 = vmatprep.subr.mxu0 %v2396_v54 }
 0x31c   : > { %2011 = vmatpush3.msra.mxu1 %v2790_v16  ;;  %2044 = vmatpush3.msra.mxu0 %v1022_v48 }
 0x31d   : > { %2012 = vmatprep.subr.mxu1 %v2396_v54  ;;  %2045 = vmatprep.subr.mxu0 %v2396_v54 }
 0x31e   : > { %2013 = vmatpush3.msra.mxu1 %v2778_v7  ;;  %2046 = vmatpush3.msra.mxu0 %v1021_v49 }
 0x31f   : > { %2014 = vmatprep.subr.mxu1 %v2396_v54  ;;  %2047 = vmatprep.subr.mxu0 %v2396_v54 }
 0x320   : > { %2015 = vmatpush3.msra.mxu1 %v2782_v10  ;;  %2048 = vmatpush3.msra.mxu0 %v1020_v50 }
 0x321   : > { %2016 = vmatprep.subr.mxu1 %v2396_v54  ;;  %2049 = vmatprep.subr.mxu0 %v2396_v54 }
 0x322   : > { %2017 = vmatpush3.msra.mxu1 %v2770_v1  ;;  %2050 = vmatpush3.msra.mxu0 %v1019_v51 }
 0x323   : > { %2018 = vmatprep.subr.mxu1 %v2396_v54  ;;  %2051 = vmatprep.subr.mxu0 %v2396_v54 }
 0x324   : > { %2019 = vmatpush3.msra.mxu1 %v2774_v4  ;;  %2052 = vmatpush3.msra.mxu0 %v1018_v52 }
 0x325   : > { %2020 = vmatprep.subr.mxu1 %v2396_v54  ;;  %2053 = vmatprep.subr.mxu0 %v2396_v54 }
 0x326   : > { %2021 = vmatpush3.msra.mxu1 %v2759_v59  ;;  %2054 = vmatpush3.msra.mxu0 %v1017_v53  ;;  %v1014_v59 = vld [vmem:[#allocation5 + $0x1] sm:$0x1] }
 0x327   : > { %2022 = vmatprep.subr.mxu1 %v2396_v54  ;;  %2055 = vmatprep.subr.mxu0 %v2396_v54 }
 0x328   : > { %2023 = vmatpush3.msra.mxu1 %v2766_v62  ;;  %2056 = vmatpush3.msra.mxu0 %v1016_v55 }
 0x329   : > { %2057 = vmatprep.subr.mxu0 %v2396_v54  ;;  %2025 = vmatmul.mubr.f32.vlgmr.msra.gmra.mxu1 %v2398_v57 }
 0x32a   : > { %2058 = vmatpush3.msra.mxu0 %v1015_v56 }
 0x32b   : > { %2060 = vmatmul.mubr.f32.vlgmr.msra.gmra.mxu0 %v2398_v57 }
 0x3e9   : > { %v1008_v60 = vpop.f32.mrf.mxu1 }
 0x3ea   : > { %v1012_v61 = vadd.f32 %v1008_v60, %v941_v58 }
 0x3eb   : > { %v1097_v63 = vpop.f32.mrf.mxu0  ;;  %v2026_v0 = vpop.f32.mrf.mxu1 }
 0x3ec   : > { %1013 = vst [vmem:[#allocation5] sm:$0x1] %v1012_v61  ;;  %v1101_v1 = vadd.f32 %v1097_v63, %v1014_v59 }
 0x3ed   : > { %v2061_v2 = vpop.f32.mrf.mxu0 }
 0x3ee   : > { %1102 = vst [vmem:[#allocation5 + $0x1] sm:$0x1] %v1101_v1 }
 0x3ef PF: > { %p1662_p5 = scmp.ne.s32.totalorder %s2378_s22, 2 }
 0x3f0   : > { %s2917_s22 = scalar_lea.vmem (!%p1662_p5), [#allocation3], %s2506_s13 }
 0x3f1   : > { %1106 = sbr.rel (%p1662_p5) target bundleno = 1592 (0x638), region = 56 }
 0x3f6   : > { %v1192_v54 = vld [vmem:[%s3132_s3 + $0x78] sm:$0xff]  ;;  %v1191_v62 = vld [vmem:[%s3132_s3 + $0x70] sm:$0xff]  ;;  %v1190_v3 = vld [vmem:[%s3132_s3 + $0x68] sm:$0xff]  ;;  %v1137_v19 = vlaneseq }
 0x3f7   : > { %2062 = vmatprep.subr.mxu0 %v1192_v54  ;;  %2118 = vmatprep.subr.mxu1 %v1192_v54  ;;  %v1189_v4 = vld [vmem:[%s3132_s3 + $0x60] sm:$0xff]  ;;  %v1188_v7 = vld [vmem:[%s3132_s3 + $0x58] sm:$0xff]  ;;  %v1187_v10 = vld [vmem:[%s3132_s3 + $0x50] sm:$0xff] }
 0x3f8   : > { %2063 = vmatpush3.msra.mxu0 %v1192_v54  ;;  %2134 = vmatpush3.msra.mxu1 %v1192_v54  ;;  %v1107_v5 = vld [vmem:[#allocation5] sm:$0x1]  ;;  %v1109_v6 = vld [vmem:[#allocation5 + $0x1] sm:$0x1]  ;;  %v1186_v12 = vld [vmem:[%s3132_s3 + $0x48] sm:$0xff]  ;;  %v1138_v22 = vshrl.u32 %v1137_v19, 7 }
 0x3f9   : > { %2064 = vmatprep.subr.mxu0 %v1191_v62  ;;  %2119 = vmatprep.subr.mxu1 %v1191_v62  ;;  %v2872_v8 = vmul.f32 0.00390625, %v1107_v5  ;;  %v1110_v9 = vmul.f32 0.00390625, %v1109_v6  ;;  %v1185_v14 = vld [vmem:[%s3132_s3 + $0x40] sm:$0xff]  ;;  %v1184_v16 = vld [vmem:[%s3132_s3 + $0x38] sm:$0xff]  ;;  %v1183_v17 = vld [vmem:[%s3132_s3 + $0x30] sm:$0xff] }
 0x3fa   : > { %2065 = vmatpush3.msra.mxu0 %v1191_v62  ;;  %2135 = vmatpush3.msra.mxu1 %v1191_v62  ;;  %v1182_v18 = vld [vmem:[%s3132_s3 + $0x28] sm:$0xff]  ;;  %v1181_v20 = vld [vmem:[%s3132_s3 + $0x20] sm:$0xff]  ;;  %v1180_v21 = vld [vmem:[%s3132_s3 + $0x18] sm:$0xff]  ;;  %v1139_v27 = vsub.s32 0, %v1138_v22 }
 0x3fb   : > { %2066 = vmatprep.subr.mxu0 %v1190_v3  ;;  %2120 = vmatprep.subr.mxu1 %v1190_v3  ;;  %v1111_v11 = vmul.f32 %v2872_v8, %v2872_v8  ;;  %v1179_v23 = vld [vmem:[%s3132_s3 + $0x10] sm:$0xff]  ;;  %v1115_v24 = vld [vmem:[%s3133_s4 + $0x4] sm:$0x1]  ;;  %v1178_v26 = vld [vmem:[%s3132_s3 + $0x8] sm:$0xff] }
 0x3fc   : > { %2067 = vmatpush3.msra.mxu0 %v1190_v3  ;;  %2136 = vmatpush3.msra.mxu1 %v1190_v3  ;;  %v1177_v29 = vld [vmem:[%s3132_s3] sm:$0xff]  ;;  %v1122_v37 = vld [vmem:[%s2917_s22 + $0x8] sm:$0xff]  ;;  %v1123_v33 = vld [vmem:[%s2917_s22 + $0x10] sm:$0xff] }
 0x3fd   : > { %2068 = vmatprep.subr.mxu0 %v1189_v4  ;;  %2121 = vmatprep.subr.mxu1 %v1189_v4  ;;  %v1112_v13 = vsub.f32 %v1110_v9, %v1111_v11  ;;  %v1117_v30 = vld [vmem:[%s3133_s4 + $0x5] sm:$0x1]  ;;  %v1130_v25 = vld [vmem:[%s2917_s22 + $0x48] sm:$0xff]  ;;  %v1124_v38 = vld [vmem:[%s2917_s22 + $0x18] sm:$0xff] }
 0x3fe   : > { %2069 = vmatpush3.msra.mxu0 %v1189_v4  ;;  %2137 = vmatpush3.msra.mxu1 %v1189_v4  ;;  %v1121_v32 = vld [vmem:[%s2917_s22] sm:$0xff]  ;;  %v1131_v39 = vld [vmem:[%s2917_s22 + $0x50] sm:$0xff]  ;;  %v1132_v43 = vld [vmem:[%s2917_s22 + $0x58] sm:$0xff] }
 0x3ff   : > { %2070 = vmatprep.subr.mxu0 %v1188_v7  ;;  %2122 = vmatprep.subr.mxu1 %v1188_v7  ;;  %v1113_v15 = vadd.f32 1e-05, %v1112_v13  ;;  %v1129_v34 = vld [vmem:[%s2917_s22 + $0x40] sm:$0xff]  ;;  %v1126_v55 = vld [vmem:[%s2917_s22 + $0x28] sm:$0xff]  ;;  %v1127_v63 = vld [vmem:[%s2917_s22 + $0x30] sm:$0xff] }
 0x400   : > { %2071 = vmatpush3.msra.mxu0 %v1188_v7  ;;  %2138 = vmatpush3.msra.mxu1 %v1188_v7  ;;  %v1125_v44 = vld [vmem:[%s2917_s22 + $0x20] sm:$0xff]  ;;  %v1134_v57 = vld [vmem:[%s2917_s22 + $0x68] sm:$0xff]  ;;  %v1135_v2 = vld [vmem:[%s2917_s22 + $0x70] sm:$0xff] }
 0x401   : > { %2072 = vmatprep.subr.mxu0 %v1187_v10  ;;  %2123 = vmatprep.subr.mxu1 %v1187_v10  ;;  %2232 = vrsqrt.f32 %v1113_v15  ;;  %v1133_v45 = vld [vmem:[%s2917_s22 + $0x60] sm:$0xff] }
 0x402   : > { %2073 = vmatpush3.msra.mxu0 %v1187_v10  ;;  %2139 = vmatpush3.msra.mxu1 %v1187_v10  ;;  %v1136_v10 = vld [vmem:[%s2917_s22 + $0x78] sm:$0xff] }
 0x403   : > { %2074 = vmatprep.subr.mxu0 %v1186_v12  ;;  %2124 = vmatprep.subr.mxu1 %v1186_v12 }
 0x404   : > { %2075 = vmatpush3.msra.mxu0 %v1186_v12  ;;  %2140 = vmatpush3.msra.mxu1 %v1186_v12 }
 0x405   : > { %2076 = vmatprep.subr.mxu0 %v1185_v14  ;;  %2125 = vmatprep.subr.mxu1 %v1185_v14 }
 0x406   : > { %2077 = vmatpush3.msra.mxu0 %v1185_v14  ;;  %2141 = vmatpush3.msra.mxu1 %v1185_v14 }
 0x407   : > { %2078 = vmatprep.subr.mxu0 %v1184_v16  ;;  %2126 = vmatprep.subr.mxu1 %v1184_v16 }
 0x408   : > { %2079 = vmatpush3.msra.mxu0 %v1184_v16  ;;  %2142 = vmatpush3.msra.mxu1 %v1184_v16 }
 0x409   : > { %2080 = vmatprep.subr.mxu0 %v1183_v17  ;;  %2127 = vmatprep.subr.mxu1 %v1183_v17 }
 0x40a   : > { %2081 = vmatpush3.msra.mxu0 %v1183_v17  ;;  %2143 = vmatpush3.msra.mxu1 %v1183_v17 }
 0x40b   : > { %2082 = vmatprep.subr.mxu0 %v1182_v18  ;;  %2128 = vmatprep.subr.mxu1 %v1182_v18 }
 0x40c   : > { %2083 = vmatpush3.msra.mxu0 %v1182_v18  ;;  %2144 = vmatpush3.msra.mxu1 %v1182_v18 }
 0x40d   : > { %2084 = vmatprep.subr.mxu0 %v1181_v20  ;;  %2129 = vmatprep.subr.mxu1 %v1181_v20 }
 0x40e   : > { %2085 = vmatpush3.msra.mxu0 %v1181_v20  ;;  %2145 = vmatpush3.msra.mxu1 %v1181_v20  ;;  %v2233_v28 = vpop.eup %2232  ;;  %v2937_v20 = vand.u32 127, %v1137_v19 }
 0x40f   : > { %2086 = vmatprep.subr.mxu0 %v1180_v21  ;;  %2130 = vmatprep.subr.mxu1 %v1180_v21  ;;  %v1116_v31 = vmul.f32 %v2233_v28, %v1115_v24 }
 0x410   : > { %2087 = vmatpush3.msra.mxu0 %v1180_v21  ;;  %2146 = vmatpush3.msra.mxu1 %v1180_v21  ;;  %v1663_v21 = vld [vmem:[%s3133_s4 + $0x6] ss:$0 sm:$0xff]  ;;  %vm1345_vm3 = vcmp.lt.s32.totalorder %v2937_v20, 10 }
 0x411   : > { %2088 = vmatprep.subr.mxu0 %v1179_v23  ;;  %2131 = vmatprep.subr.mxu1 %v1179_v23  ;;  %v1118_v35 = vmul.f32 %v1116_v31, %v2872_v8  ;;  %v1140_v36 = vrot.slane %v1116_v31, %v1139_v27  ;;  %v1128_v8 = vld [vmem:[%s2917_s22 + $0x38] sm:$0xff] }
 0x412   : > { %2089 = vmatpush3.msra.mxu0 %v1179_v23  ;;  %2147 = vmatpush3.msra.mxu1 %v1179_v23 }
 0x413   : > { %2090 = vmatprep.subr.mxu0 %v1178_v26  ;;  %2132 = vmatprep.subr.mxu1 %v1178_v26  ;;  %v1119_v40 = vsub.f32 %v1117_v30, %v1118_v35  ;;  %v1141_v41 = vmul.f32 %v1140_v36, %v1121_v32  ;;  %v1149_v42 = vmul.f32 %v1140_v36, %v1129_v34 }
 0x414   : > { %2091 = vmatpush3.msra.mxu0 %v1178_v26  ;;  %2148 = vmatpush3.msra.mxu1 %v1178_v26  ;;  %v1142_v46 = vmul.f32 %v1140_v36, %v1122_v37  ;;  %v1150_v47 = vmul.f32 %v1140_v36, %v1130_v25  ;;  %v1143_v48 = vmul.f32 %v1140_v36, %v1123_v33 }
 0x415   : > { %2092 = vmatprep.subr.mxu0 %v1177_v29  ;;  %2133 = vmatprep.subr.mxu1 %v1177_v29  ;;  %v1160_v49 = vrot.slane %v1119_v40, %v1139_v27  ;;  %v1151_v50 = vmul.f32 %v1140_v36, %v1131_v39  ;;  %v1144_v51 = vmul.f32 %v1140_v36, %v1124_v38 }
 0x416   : > { %2093 = vmatpush3.msra.mxu0 %v1177_v29  ;;  %2149 = vmatpush3.msra.mxu1 %v1177_v29  ;;  %v1152_v52 = vmul.f32 %v1140_v36, %v1132_v43  ;;  %v1145_v53 = vmul.f32 %v1140_v36, %v1125_v44  ;;  %v1153_v56 = vmul.f32 %v1140_v36, %v1133_v45 }
 0x417   : > { %v1161_v58 = vadd.f32 %v1160_v49, %v1141_v41  ;;  %v1169_v60 = vadd.f32 %v1160_v49, %v1149_v42  ;;  %v1162_v59 = vadd.f32 %v1160_v49, %v1142_v46  ;;  %v1170_v61 = vadd.f32 %v1160_v49, %v1150_v47 }
 0x418   : > { %v1163_v0 = vadd.f32 %v1160_v49, %v1143_v48  ;;  %v1171_v1 = vadd.f32 %v1160_v49, %v1151_v50  ;;  %v1146_v54 = vmul.f32 %v1140_v36, %v1126_v55  ;;  %v1154_v62 = vmul.f32 %v1140_v36, %v1134_v57 }
 0x419   : > { %2094 = vmatprep.mubr.f32.mxu0 %v1161_v58  ;;  %2106 = vmatprep.mubr.f32.mxu1 %v1169_v60  ;;  %v1164_v3 = vadd.f32 %v1160_v49, %v1144_v51  ;;  %v1172_v4 = vadd.f32 %v1160_v49, %v1152_v52  ;;  %v1147_v5 = vmul.f32 %v1140_v36, %v1127_v63 }
 0x41a   : > { %2095 = vmatmul.mubr.f32.vlgmr.msra.gmra.mxu0 %v1162_v59  ;;  %2107 = vmatmul.mubr.f32.vlgmr.msra.gmra.mxu1 %v1170_v61  ;;  %v1165_v6 = vadd.f32 %v1160_v49, %v1145_v53  ;;  %v1173_v7 = vadd.f32 %v1160_v49, %v1153_v56  ;;  %v1155_v9 = vmul.f32 %v1140_v36, %v1135_v2 }
 0x41b   : > { %2097 = vmatprep.mubr.f32.mxu0 %v1163_v0  ;;  %2109 = vmatprep.mubr.f32.mxu1 %v1171_v1  ;;  %v1166_v11 = vadd.f32 %v1160_v49, %v1146_v54  ;;  %v1174_v12 = vadd.f32 %v1160_v49, %v1154_v62  ;;  %v1148_v13 = vmul.f32 %v1140_v36, %v1128_v8 }
 0x41c   : > { %v1156_v14 = vmul.f32 %v1140_v36, %v1136_v10  ;;  %v1167_v15 = vadd.f32 %v1160_v49, %v1147_v5  ;;  %v1175_v16 = vadd.f32 %v1160_v49, %v1155_v9 }
 0x41d   : > { %v1168_v17 = vadd.f32 %v1160_v49, %v1148_v13 }
 0x41e   : > { %2098 = vmatmul.mubr.f32.gmra.mxu0 %v1164_v3  ;;  %2110 = vmatmul.mubr.f32.gmra.mxu1 %v1172_v4  ;;  %v1176_v18 = vadd.f32 %v1160_v49, %v1156_v14 }
 0x41f   : > { %2100 = vmatprep.mubr.f32.mxu0 %v1165_v6  ;;  %2112 = vmatprep.mubr.f32.mxu1 %v1173_v7 }
 0x422   : > { %2101 = vmatmul.mubr.f32.gmra.mxu0 %v1166_v11  ;;  %2113 = vmatmul.mubr.f32.gmra.mxu1 %v1174_v12 }
 0x423   : > { %2103 = vmatprep.mubr.f32.mxu0 %v1167_v15  ;;  %2115 = vmatprep.mubr.f32.mxu1 %v1175_v16 }
 0x426   : > { %2104 = vmatmul.mubr.f32.gmra.mxu0 %v1168_v17  ;;  %2116 = vmatmul.mubr.f32.gmra.mxu1 %v1176_v18 }
 0x4da   : > { %v2096_v22 = vpop.f32.mrf.mxu0  ;;  %v2108_v23 = vpop.f32.mrf.mxu1 }
 0x4db   : > { %v1270_v24 = vadd.f32 %v2096_v22, %v1663_v21  ;;  %v1310_v26 = vadd.f32 %v2108_v23, %v1663_v21 }
 0x4dc   : > { %v1264_v27 = vpop.f32.mrf.mxu0  ;;  %v1304_v28 = vpop.f32.mrf.mxu1 }
 0x4dd   : > { %v1265_v29 = vadd.f32 %v1663_v21, %v1264_v27  ;;  %v1355_v31 = vsel %vm1345_vm3, %v1310_v26, -1e+30  ;;  %v1347_v19 = vsel %vm1345_vm3, %v1270_v24, -1e+30  ;;  %v1305_v37 = vadd.f32 %v1663_v21, %v1304_v28 }
 0x4de   : > { %1380 = vmax.xlane.f32.xlu1 %v1355_v31  ;;  %1364 = vmax.xlane.f32.xlu0 %v1347_v19  ;;  %v2099_v30 = vpop.f32.mrf.mxu0  ;;  %v2111_v32 = vpop.f32.mrf.mxu1 }
 0x4df   : > { %v1280_v34 = vadd.f32 %v2099_v30, %v1663_v21  ;;  %v1320_v35 = vadd.f32 %v2111_v32, %v1663_v21  ;;  %v1346_v33 = vsel %vm1345_vm3, %v1265_v29, -1e+30  ;;  %v1354_v45 = vsel %vm1345_vm3, %v1305_v37, -1e+30 }
 0x4e0   : > { %v1274_v36 = vpop.f32.mrf.mxu0  ;;  %v1314_v38 = vpop.f32.mrf.mxu1 }
 0x4e1   : > { %v1349_v25 = vsel %vm1345_vm3, %v1280_v34, -1e+30  ;;  %v1357_v40 = vsel %vm1345_vm3, %v1320_v35, -1e+30  ;;  %v1275_v43 = vadd.f32 %v1663_v21, %v1274_v36  ;;  %v1315_v44 = vadd.f32 %v1663_v21, %v1314_v38 }
 0x4e2   : > { %1368 = vmax.xlane.f32.xlu1 %v1349_v25  ;;  %1362 = vmax.xlane.f32.xlu0 %v1346_v33  ;;  %v2102_v39 = vpop.f32.mrf.mxu0  ;;  %v2114_v42 = vpop.f32.mrf.mxu1 }
 0x4e3   : > { %v1290_v46 = vadd.f32 %v2102_v39, %v1663_v21  ;;  %v1348_v50 = vsel %vm1345_vm3, %v1275_v43, -1e+30  ;;  %v1356_v51 = vsel %vm1345_vm3, %v1315_v44, -1e+30  ;;  %v1330_v52 = vadd.f32 %v2114_v42, %v1663_v21 }
 0x4e4   : > { %v1284_v41 = vpop.f32.mrf.mxu0  ;;  %v1324_v48 = vpop.f32.mrf.mxu1 }
 0x4e5   : > { %v1285_v47 = vadd.f32 %v1663_v21, %v1284_v41  ;;  %v1325_v53 = vadd.f32 %v1663_v21, %v1324_v48  ;;  %v1351_v55 = vsel %vm1345_vm3, %v1290_v46, -1e+30  ;;  %v1359_v61 = vsel %vm1345_vm3, %v1330_v52, -1e+30 }
 0x4e6   : > { %1384 = vmax.xlane.f32.xlu1 %v1357_v40  ;;  %1378 = vmax.xlane.f32.xlu0 %v1354_v45  ;;  %v2105_v49 = vpop.f32.mrf.mxu0  ;;  %v2117_v58 = vpop.f32.mrf.mxu1 }
 0x4e7   : > { %v1350_v56 = vsel %vm1345_vm3, %v1285_v47, -1e+30  ;;  %v1300_v60 = vadd.f32 %v2105_v49, %v1663_v21  ;;  %v1358_v63 = vsel %vm1345_vm3, %v1325_v53, -1e+30  ;;  %v1340_v1 = vadd.f32 %v2117_v58, %v1663_v21 }
 0x4e8   : > { %v1294_v57 = vpop.f32.mrf.mxu0  ;;  %v1334_v0 = vpop.f32.mrf.mxu1 }
 0x4e9   : > { %v1295_v59 = vadd.f32 %v1663_v21, %v1294_v57  ;;  %v1335_v2 = vadd.f32 %v1663_v21, %v1334_v0  ;;  %v1353_v54 = vsel %vm1345_vm3, %v1300_v60, -1e+30  ;;  %v2976_v3 = vsel %vm1345_vm3, %v1340_v1, -1e+30 }
 0x4ea   : > { %1366 = vmax.xlane.f32.xlu1 %v1348_v50  ;;  %1382 = vmax.xlane.f32.xlu0 %v1356_v51 }
 0x4eb   : > { %v2971_v62 = vsel %vm1345_vm3, %v1295_v59, -1e+30  ;;  %v2980_v4 = vsel %vm1345_vm3, %v1335_v2, -1e+30 }
 0x4ee   : > { %1372 = vmax.xlane.f32.xlu1 %v1351_v55  ;;  %1370 = vmax.xlane.f32.xlu0 %v1350_v56 }
 0x4f2   : > { %1388 = vmax.xlane.f32.xlu1 %v1359_v61  ;;  %1386 = vmax.xlane.f32.xlu0 %v1358_v63 }
 0x4f6   : > { %1376 = vmax.xlane.f32.xlu1 %v1353_v54  ;;  %1374 = vmax.xlane.f32.xlu0 %v2971_v62 }
 0x4fa   : > { %1392 = vmax.xlane.f32.xlu1 %v2976_v3  ;;  %1390 = vmax.xlane.f32.xlu0 %v2980_v4 }
 0x567   : > { %v1381_v5 = vpop.xlane.xlu1 %1380  ;;  %v1365_v6 = vpop.xlane.xlu0 %1364 }
 0x568   : > { %v2984_v7 = vsub.f32 %v1355_v31, %v1381_v5  ;;  %v2986_v8 = vsub.f32 %v1347_v19, %v1365_v6 }
 0x56a   : > { %v1412_v9 = vmul.f32 1.442695, %v2986_v8  ;;  %v1428_v12 = vmul.f32 1.442695, %v2984_v7 }
 0x56b   : > { %v1369_v10 = vpop.xlane.xlu1 %1368  ;;  %v1363_v11 = vpop.xlane.xlu0 %1362 }
 0x56c   : > { %v2990_v13 = vsub.f32 %v1349_v25, %v1369_v10  ;;  %v2992_v14 = vsub.f32 %v1346_v33, %v1363_v11  ;;  %2234 = vpow2.f32 %v1412_v9 }
 0x56d   : > { %2236 = vpow2.f32 %v1428_v12 }
 0x56e   : > { %v1410_v15 = vmul.f32 1.442695, %v2992_v14  ;;  %v1416_v18 = vmul.f32 1.442695, %v2990_v13 }
 0x56f   : > { %v1385_v16 = vpop.xlane.xlu1 %1384  ;;  %v1379_v17 = vpop.xlane.xlu0 %1378 }
 0x570   : > { %v2996_v20 = vsub.f32 %v1354_v45, %v1379_v17  ;;  %2238 = vpow2.f32 %v1410_v15  ;;  %v2998_v21 = vsub.f32 %v1357_v40, %v1385_v16 }
 0x571   : > { %2240 = vpow2.f32 %v1416_v18 }
 0x572   : > { %v1426_v22 = vmul.f32 1.442695, %v2996_v20  ;;  %v1432_v27 = vmul.f32 1.442695, %v2998_v21 }
 0x573   : > { %v1367_v23 = vpop.xlane.xlu1 %1366  ;;  %v1383_v24 = vpop.xlane.xlu0 %1382 }
 0x574   : > { %v3001_v26 = vsub.f32 %v1348_v50, %v1367_v23  ;;  %2242 = vpow2.f32 %v1426_v22  ;;  %v3004_v28 = vsub.f32 %v1356_v51, %v1383_v24 }
 0x576   : > { %v1414_v29 = vmul.f32 1.442695, %v3001_v26  ;;  %v1430_v32 = vmul.f32 1.442695, %v3004_v28 }
 0x577   : > { %v1373_v31 = vpop.xlane.xlu1 %1372  ;;  %v1371_v19 = vpop.xlane.xlu0 %1370 }
 0x578   : > { %2244 = vpow2.f32 %v1414_v29  ;;  %v3007_v30 = vsub.f32 %v1351_v55, %v1373_v31  ;;  %v3010_v34 = vsub.f32 %v1350_v56, %v1371_v19 }
 0x579   : > { %2246 = vpow2.f32 %v1432_v27  ;;  %v2235_v35 = vpop.eup %2234 }
 0x57a   : > { %v1420_v36 = vmul.f32 1.442695, %v3007_v30  ;;  %1444 = vadd.xlane.f32.xlu1 %v2235_v35  ;;  %v2237_v38 = vpop.eup %2236  ;;  %v1418_v39 = vmul.f32 1.442695, %v3010_v34 }
 0x57b   : > { %v1389_v37 = vpop.xlane.xlu1 %1388  ;;  %v1387_v25 = vpop.xlane.xlu0 %1386 }
 0x57c   : > { %2248 = vpow2.f32 %v1420_v36  ;;  %v3013_v33 = vsub.f32 %v1359_v61, %v1389_v37  ;;  %v3016_v40 = vsub.f32 %v1358_v63, %v1387_v25 }
 0x57d   : > { %2250 = vpow2.f32 %v1430_v32  ;;  %v2239_v41 = vpop.eup %2238 }
 0x57e   : > { %v1436_v42 = vmul.f32 1.442695, %v3013_v33  ;;  %1460 = vadd.xlane.f32.xlu1 %v2237_v38  ;;  %1442 = vadd.xlane.f32.xlu0 %v2239_v41  ;;  %v2241_v46 = vpop.eup %2240  ;;  %v1434_v47 = vmul.f32 1.442695, %v3016_v40 }
 0x57f   : > { %v1377_v43 = vpop.xlane.xlu1 %1376  ;;  %v1375_v44 = vpop.xlane.xlu0 %1374 }
 0x580   : > { %2252 = vpow2.f32 %v1436_v42  ;;  %v3019_v45 = vsub.f32 %v1353_v54, %v1377_v43  ;;  %v3023_v48 = vsub.f32 %v2971_v62, %v1375_v44 }
 0x581   : > { %2254 = vpow2.f32 %v1418_v39  ;;  %v2243_v49 = vpop.eup %2242 }
 0x582   : > { %v1424_v50 = vmul.f32 1.442695, %v3019_v45  ;;  %1448 = vadd.xlane.f32.xlu1 %v2241_v46  ;;  %1458 = vadd.xlane.f32.xlu0 %v2243_v49  ;;  %v1422_v56 = vmul.f32 1.442695, %v3023_v48 }
 0x583   : > { %v1393_v51 = vpop.xlane.xlu1 %1392  ;;  %v1391_v52 = vpop.xlane.xlu0 %1390 }
 0x584   : > { %2256 = vpow2.f32 %v1424_v50  ;;  %v3027_v53 = vsub.f32 %v2976_v3, %v1393_v51  ;;  %v3031_v57 = vsub.f32 %v2980_v4, %v1391_v52 }
 0x585   : > { %v2245_v55 = vpop.eup %2244  ;;  %2258 = vpow2.f32 %v1434_v47 }
 0x586   : > { %v2247_v58 = vpop.eup %2246  ;;  %v1440_v60 = vmul.f32 1.442695, %v3027_v53  ;;  %1446 = vadd.xlane.f32.xlu0 %v2245_v55  ;;  %v1438_v61 = vmul.f32 1.442695, %v3031_v57 }
 0x587   : > { %1464 = vadd.xlane.f32.xlu1 %v2247_v58 }
 0x588   : > { %2260 = vpow2.f32 %v1440_v60 }
 0x589   : > { %v2249_v59 = vpop.eup %2248  ;;  %2262 = vpow2.f32 %v1422_v56 }
 0x58a   : > { %v2251_v63 = vpop.eup %2250  ;;  %2264 = vpow2.f32 %v1438_v61 }
 0x58b   : > { %1452 = vadd.xlane.f32.xlu1 %v2249_v59  ;;  %1462 = vadd.xlane.f32.xlu0 %v2251_v63 }
 0x58d   : > { %v2253_v0 = vpop.eup %2252 }
 0x58e   : > { %v2255_v1 = vpop.eup %2254 }
 0x58f   : > { %1468 = vadd.xlane.f32.xlu1 %v2253_v0  ;;  %1450 = vadd.xlane.f32.xlu0 %v2255_v1 }
 0x591   : > { %v2257_v2 = vpop.eup %2256 }
 0x592   : > { %v2259_v54 = vpop.eup %2258 }
 0x593   : > { %1456 = vadd.xlane.f32.xlu1 %v2257_v2  ;;  %1466 = vadd.xlane.f32.xlu0 %v2259_v54 }
 0x595   : > { %v2261_v62 = vpop.eup %2260 }
 0x596   : > { %v2263_v3 = vpop.eup %2262 }
 0x597   : > { %1472 = vadd.xlane.f32.xlu1 %v2261_v62  ;;  %1454 = vadd.xlane.f32.xlu0 %v2263_v3  ;;  %v2265_v4 = vpop.eup %2264 }
 0x59b   : > { %1470 = vadd.xlane.f32.xlu0 %v2265_v4 }
 0x603   : > { %v1445_v5 = vpop.xlane.xlu1 %1444 }
 0x604   : > { %2266 = vlog2.f32 %v1445_v5 }
 0x607   : > { %v1461_v6 = vpop.xlane.xlu1 %1460  ;;  %v1443_v9 = vpop.xlane.xlu0 %1442 }
 0x608   : > { %2268 = vlog2.f32 %v1461_v6 }
 0x609   : > { %2270 = vlog2.f32 %v1443_v9 }
 0x60b   : > { %v1449_v10 = vpop.xlane.xlu1 %1448  ;;  %v1459_v11 = vpop.xlane.xlu0 %1458 }
 0x60c   : > { %2272 = vlog2.f32 %v1449_v10 }
 0x60d   : > { %2274 = vlog2.f32 %v1459_v11 }
 0x60f   : > { %v1447_v15 = vpop.xlane.xlu0 %1446 }
 0x610   : > { %v1465_v12 = vpop.xlane.xlu1 %1464 }
 0x611   : > { %2276 = vlog2.f32 %v1465_v12  ;;  %v2267_v16 = vpop.eup %2266 }
 0x612   : > { %2278 = vlog2.f32 %v1447_v15  ;;  %v1477_v17 = vmul.f32 0.6931472, %v2267_v16 }
 0x614   : > { %v1453_v18 = vpop.xlane.xlu1 %1452  ;;  %v1463_v22 = vpop.xlane.xlu0 %1462  ;;  %v1507_v23 = vsub.f32 %v2986_v8, %v1477_v17 }
 0x615   : > { %2280 = vlog2.f32 %v1453_v18  ;;  %v2269_v24 = vpop.eup %2268 }
 0x616   : > { %2282 = vlog2.f32 %v1463_v22  ;;  %v2271_v27 = vpop.eup %2270  ;;  %1523 = vst [vmem:[%s2515_s26 + $0x8] sm:$0xff] %v1507_v23  ;;  %v1493_v29 = vmul.f32 0.6931472, %v2269_v24 }
 0x617   : > { %v1475_v31 = vmul.f32 0.6931472, %v2271_v27 }
 0x618   : > { %v1469_v19 = vpop.xlane.xlu1 %1468  ;;  %v1451_v32 = vpop.xlane.xlu0 %1450  ;;  %v1515_v35 = vsub.f32 %v2984_v7, %v1493_v29 }
 0x619   : > { %2284 = vlog2.f32 %v1469_v19  ;;  %v2273_v36 = vpop.eup %2272  ;;  %v1506_v37 = vsub.f32 %v2992_v14, %v1475_v31 }
 0x61a   : > { %2286 = vlog2.f32 %v1451_v32  ;;  %v2275_v8 = vpop.eup %2274  ;;  %1531 = vst [vmem:[%s2515_s26 + $0x48] sm:$0xff] %v1515_v35  ;;  %v1481_v25 = vmul.f32 0.6931472, %v2273_v36 }
 0x61b   : > { %1522 = vst [vmem:[%s2515_s26] sm:$0xff] %v1506_v37  ;;  %v1491_v38 = vmul.f32 0.6931472, %v2275_v8 }
 0x61c   : > { %v1457_v39 = vpop.xlane.xlu1 %1456  ;;  %v1467_v41 = vpop.xlane.xlu0 %1466  ;;  %v1509_v42 = vsub.f32 %v2990_v13, %v1481_v25 }
 0x61d   : > { %2288 = vlog2.f32 %v1457_v39  ;;  %v1514_v7 = vsub.f32 %v2996_v20, %v1491_v38 }
 0x61e   : > { %v2277_v43 = vpop.eup %2276  ;;  %2290 = vlog2.f32 %v1467_v41  ;;  %1525 = vst [vmem:[%s2515_s26 + $0x18] sm:$0xff] %v1509_v42 }
 0x61f   : > { %v2279_v44 = vpop.eup %2278  ;;  %v1497_v14 = vmul.f32 0.6931472, %v2277_v43  ;;  %1530 = vst [vmem:[%s2515_s26 + $0x40] sm:$0xff] %v1514_v7 }
 0x620   : > { %v1479_v46 = vmul.f32 0.6931472, %v2279_v44  ;;  %v1473_v47 = vpop.xlane.xlu1 %1472  ;;  %v1455_v49 = vpop.xlane.xlu0 %1454 }
 0x621   : > { %v1517_v50 = vsub.f32 %v2998_v21, %v1497_v14  ;;  %2292 = vlog2.f32 %v1473_v47 }
 0x622   : > { %v2281_v51 = vpop.eup %2280  ;;  %v1508_v13 = vsub.f32 %v3001_v26, %v1479_v46  ;;  %2294 = vlog2.f32 %v1455_v49 }
 0x623   : > { %v2283_v52 = vpop.eup %2282  ;;  %1533 = vst [vmem:[%s2515_s26 + $0x58] sm:$0xff] %v1517_v50  ;;  %v1485_v20 = vmul.f32 0.6931472, %v2281_v51 }
 0x624   : > { %1524 = vst [vmem:[%s2515_s26 + $0x10] sm:$0xff] %v1508_v13  ;;  %v1495_v55 = vmul.f32 0.6931472, %v2283_v52  ;;  %v1471_v56 = vpop.xlane.xlu0 %1470 }
 0x625   : > { %v1511_v58 = vsub.f32 %v3007_v30, %v1485_v20  ;;  %2296 = vlog2.f32 %v1471_v56 }
 0x626   : > { %v2285_v60 = vpop.eup %2284  ;;  %v1516_v21 = vsub.f32 %v3004_v28, %v1495_v55 }
 0x627   : > { %v2287_v59 = vpop.eup %2286  ;;  %1527 = vst [vmem:[%s2515_s26 + $0x28] sm:$0xff] %v1511_v58  ;;  %v1501_v61 = vmul.f32 0.6931472, %v2285_v60 }
 0x628   : > { %1532 = vst [vmem:[%s2515_s26 + $0x50] sm:$0xff] %v1516_v21  ;;  %v1483_v26 = vmul.f32 0.6931472, %v2287_v59 }
 0x629   : > { %v1519_v63 = vsub.f32 %v3013_v33, %v1501_v61 }
 0x62a   : > { %v2289_v0 = vpop.eup %2288  ;;  %v1510_v1 = vsub.f32 %v3010_v34, %v1483_v26 }
 0x62b   : > { %v2291_v2 = vpop.eup %2290  ;;  %1535 = vst [vmem:[%s2515_s26 + $0x68] sm:$0xff] %v1519_v63  ;;  %v1489_v30 = vmul.f32 0.6931472, %v2289_v0 }
 0x62c   : > { %1526 = vst [vmem:[%s2515_s26 + $0x20] sm:$0xff] %v1510_v1  ;;  %v1499_v54 = vmul.f32 0.6931472, %v2291_v2 }
 0x62d   : > { %v1513_v28 = vsub.f32 %v3019_v45, %v1489_v30 }
 0x62e   : > { %v2293_v62 = vpop.eup %2292  ;;  %v1518_v3 = vsub.f32 %v3016_v40, %v1499_v54 }
 0x62f   : > { %v2295_v4 = vpop.eup %2294  ;;  %1529 = vst [vmem:[%s2515_s26 + $0x38] sm:$0xff] %v1513_v28  ;;  %v1505_v5 = vmul.f32 0.6931472, %v2293_v62 }
 0x630   : > { %1534 = vst [vmem:[%s2515_s26 + $0x60] sm:$0xff] %v1518_v3  ;;  %v1487_v33 = vmul.f32 0.6931472, %v2295_v4 }
 0x631   : > { %v1521_v34 = vsub.f32 %v3027_v53, %v1505_v5 }
 0x632   : > { %v2297_v6 = vpop.eup %2296  ;;  %v1512_v9 = vsub.f32 %v3023_v48, %v1487_v33 }
 0x633   : > { %1537 = vst [vmem:[%s2515_s26 + $0x78] sm:$0xff] %v1521_v34  ;;  %v1503_v10 = vmul.f32 0.6931472, %v2297_v6 }
 0x634   : > { %1528 = vst [vmem:[%s2515_s26 + $0x30] sm:$0xff] %v1512_v9 }
 0x635   : > { %v1520_v11 = vsub.f32 %v3031_v57, %v1503_v10 }
 0x637   : > { %1536 = vst [vmem:[%s2515_s26 + $0x70] sm:$0xff] %v1520_v11 }
 0x638 PF: > { %s1669_s12 = sshll.u32 %s2374_s21, 11  ;;  %s1552_s27 = sshll.u32 %s2515_s26, 4  ;;  %s3074_s27 = int_to_ptr.vmem [resolvable:$true] %s1552_s27 }
 0x639   : > { %s3071_s16 = scalar_lea.hbm %s3134_s5, %s1669_s12  ;;  %s3078_s30 = scalar_lea.sflag [#allocation7], %s228_s10 }
 0x63a   : > { %s2298_s17 = scalar_lea.vmem %s3074_s27, 2048  ;;  %s2399_s21 = smov [#allocation6]  }
 0x63b   : > { %p2299_p6 = scmp.ne.s32.totalorder %s3074_s27, %s2298_s17  ;;  %s2302_s6 = sshll.u32 %s2399_s21, 4  ;;  %s2303_s6 = int_to_ptr.vmem [resolvable:$false] %s2302_s6 }
 0x63c   : > { %s2304_s22 = scalar_lea.vmem %s2303_s6, 4096  ;;  %p2305_p10 = scmp.lt.s32.totalorder %s3074_s27, %s2303_s6 }
 0x63d   : > { %p2300_p7 = pnand %p2299_p6, %p2484_p3  ;;  %p2306_p11 = scmp.lt.s32.totalorder %s2304_s22, %s2298_s17 }
 0x63f   : > { %p2301_p9 = pneg %p2300_p7  ;;  %p2307_p12 = por %p2306_p11, %p2305_p10 }
 0x641   : > { %p2308_p13 = pnand %p2307_p12, %p2301_p9 }
 0x643   : > { %2311 = shalt.err (!%p2308_p13)
}
 0x644   : > { %s2312_s10 = scalar_lea.hbm %s3071_s16, 2048  ;;  %s2316_s11 = scalar_lea.hbm %s3134_s5, 4096 }
 0x645   : > { %p2313_p0 = scmp.ne.s32.totalorder %s3071_s16, %s2312_s10  ;;  %p2317_p4 = scmp.lt.s32.totalorder %s3071_s16, %s3134_s5 }
 0x646   : > { %p2318_p5 = scmp.lt.s32.totalorder %s2316_s11, %s2312_s10 }
 0x647   : > { %p2314_p1 = pnand %p2313_p0, %p2484_p3 }
 0x648   : > { %p2319_p6 = por %p2318_p5, %p2317_p4 }
 0x649   : > { %p2315_p2 = pneg %p2314_p1 }
 0x64b   : > { %p2320_p7 = pnand %p2319_p6, %p2315_p2 }
 0x64d   : > { %2323 = shalt.err (!%p2320_p7)
}
 0x64e   : > { %s2400_s15 = smov 128   ;;  %s2401_s17 = smov 8  }
 0x64f   : > { %2150 = dma.vmem_to_hbm [thread:$0]  (%p2484_p3), %s3074_s27, 2048, %s3071_s16, %s3078_s30, %s2400_s15, %s2400_s15, %s2401_s17  }
 0x650 PF: > { %p2156_p9 = scmp.ge.s32.totalorder %s2390_s25, 2  ;;  %s1567_s21 = sand.u32 1, %s2362_s18  }
 0x651   : > { %s1568_s6 = scalar_lea.sflag [#allocation7], %s1567_s21 }
 0x652   : > { %p2153_p10 = pnand %p2156_p9, %p2495_p8 }
 0x654   : > { %p2154_p11 = pneg %p2153_p10 }
 0x656   : > { %2357 = dma.done.wait (%p2154_p11), %s1568_s6, 2048  }
 0x657   : > { %2359 = vsyncadd (%p2154_p11), %s1568_s6, 4294965248  ;;  %s18_s25 = sadd.s32 1, %s2390_s25   ;;  %s3137_s18 = smov %s2366_s19 }
 0x658   : > { %p15_p12 = scmp.ge.s32.totalorder %s18_s25, 8   ;;  %s3138_s19 = smov %s2370_s20 }
 0x659   : > { %s3139_s20 = smov %s2493_s8  ;;  %s3140_s21 = smov %s2382_s23 }
 0x65a   : > { %s3141_s22 = smov %s2386_s24  ;;  %s3142_s23 = smov %s3145_s28 }
 0x65b   : > { %s3143_s24 = smov %s3149_s29  ;;  %17 = sbr.rel (!%p15_p12) target bundleno = 5 (0x5), region = 95 }
 0x660   :  { %1573 = vsyncpa [#allocation7], 1 }
 0x661   :  { %1575 = vsyncpa [#allocation7 + $0x1], 1 }

</bundles_post_ra>
